<compile_context>
chip_gen: v7x
topology: tpu7x:2x2x1
jax: 0.10.0
libtpu: 0.0.40
codegen_flags: <defaults>
</compile_context>

<pallas_src>
import math

import jax
import jax.numpy as jnp
from jax.experimental import pallas as pl
from jax.experimental.pallas import tpu as pltpu

HIDDEN_SIZE = 32                          # H  (SPINN hidden size)
EMBED_SIZE = 32                           # E  (area_attn_evc feature dim)
GATE_ANGLE_NUM = 1                        # single gate-angle group -> no permute branch
NUM_EDU = 8                               # EDUs per area_attn_evc
CONCAT = 3 * HIDDEN_SIZE + EMBED_SIZE     # 128: lane-perfect contraction dim
AREA_LANES = NUM_EDU * EMBED_SIZE         # 256: lane-dense area layout
MAX_TILE_B = 512                          # sweepable batch tile upper bound
# mlp_dropout: forward evaluated in inference mode -> Dropout == identity.
# TODO(synk): training-mode dropout (Bernoulli masks) is not implemented.


def reducer_kernel(left_ref, right_ref, trk_ref, area_ref,
                   w_attn_rep_ref, s_sum_ref, s_expand_ref, s_ctx_ref,
                   w_gate_ref, b_gate_ref, w_proj_ref, b_proj_ref,
                   hc_ref, ang_ref):
    H = HIDDEN_SIZE
    f32 = jnp.float32

    # bf16 activations -> f32 for all in-kernel math (the HBM saving already
    # happened at the DMA; v5e's VPU has no bf16, so compute in f32).
    left = left_ref[...].astype(f32)          # (TM, 2H)
    right = right_ref[...].astype(f32)        # (TM, 2H)
    trk = trk_ref[...].astype(f32)            # (TM, H)   tracking (GRU path)
    area = area_ref[...].astype(f32)          # (TM, NE*E) lane-dense
    TM = left.shape[0]

    # left/right .chunk(2)
    h1 = left[:, :H]
    c1 = left[:, H:]
    h2 = right[:, :H]
    c2 = right[:, H:]

    # ---- tri_gate part 1: area attention on the 256-lane layout ------------
    # q_rep[b, e*E+d] = (trk @ w_attn)[b, d]   (query replicated per EDU)
    q_rep = jnp.dot(trk, w_attn_rep_ref[...], preferred_element_type=f32)   # (TM, 256)
    prod = area * q_rep
    # scores[b, e] = sum_d area[b, e, d] * q[b, d]  via 0/1 selection matmul
    scores = jnp.dot(prod, s_sum_ref[...], preferred_element_type=f32)      # (TM, NE)
    scores = scores - jnp.max(scores, axis=1, keepdims=True)
    pw = jnp.exp(scores)
    pw = pw * pl.reciprocal(jnp.sum(pw, axis=1, keepdims=True), approx=True)
    # pw_rep[b, e*E+d] = pw[b, e]
    pw_rep = jnp.dot(pw, s_expand_ref[...], preferred_element_type=f32)     # (TM, 256)
    # context[b, d] = sum_e pw[b, e] * area[b, e, d]
    context = jnp.dot(pw_rep * area, s_ctx_ref[...],
                      preferred_element_type=f32)                           # (TM, E)

    # ---- fused gate input: x0 = [tracking | h1 | h2 | context] -------------
    x0 = jnp.concatenate([trk, h1, h2, context], axis=1)                    # (TM, 128)

    # ---- tri_gate part 2: 3 gate angles, one K=128 matmul ------------------
    logits = (jnp.dot(x0, w_gate_ref[...], preferred_element_type=f32)
              + b_gate_ref[...])                                             # (TM, 3)
    logits = logits - jnp.max(logits, axis=1, keepdims=True)
    ea = jnp.exp(logits)
    angles = ea * pl.reciprocal(jnp.sum(ea, axis=1, keepdims=True), approx=True)
    a0 = angles[:, 0:1]
    a1 = angles[:, 1:2]
    a2 = angles[:, 2:3]

    # ---- block-wise gating of x0 via lane-index select (VPU) ---------------
    # gated_output = [a0*tracking | a1*[h1,h2] | a2*context]
    lane = jax.lax.broadcasted_iota(jnp.int32, (TM, CONCAT), 1)
    scale = jnp.where(lane < H, a0, jnp.where(lane < 3 * H, a1, a2))         # (TM, 128)
    x_gated = x0 * scale

    # ---- projection Linear(128 -> 5H): one K=128 matmul ---------------------
    proj = (jnp.dot(x_gated, w_proj_ref[...], preferred_element_type=f32)
            + b_proj_ref[...])                                               # (TM, 5H)

    # .chunk(5) -> g, i, f1, f2, o
    g = proj[:, 0:H]
    i = proj[:, H:2 * H]
    f1 = proj[:, 2 * H:3 * H]
    f2 = proj[:, 3 * H:4 * H]
    o = proj[:, 4 * H:5 * H]

    c = (jnp.tanh(g) * jax.nn.sigmoid(i)
         + jax.nn.sigmoid(f1) * c1
         + jax.nn.sigmoid(f2) * c2)
    h = jax.nn.sigmoid(o) * jnp.tanh(c)

    hc_ref[...] = jnp.concatenate([h, c], axis=1)      # (TM, 2H) = [h | c]
    ang_ref[...] = angles                              # (TM, 3)  angle_prop_all


def init_params(key):
    H, E = HIDDEN_SIZE, EMBED_SIZE
    k1, k2, k3, k4, k5 = jax.random.split(key, 5)
    din = (3 * H + E) * GATE_ANGLE_NUM

    def u(k, shape, fan_in):
        b = 1.0 / math.sqrt(fan_in)
        return jax.random.uniform(k, shape, jnp.float32, -b, b)

    return {
        "w_attn": u(k1, (H, E), H),
        "w_gate": u(k2, (din, 3), din),
        "b_gate": u(k3, (1, 3), din),
        "w_proj": u(k4, (din, 5 * H), din),
        "b_proj": u(k5, (1, 5 * H), din),
    }


def _choose_tile_b(batch, max_tile):
    """Largest 16-aligned batch tile <= max_tile that keeps >= 2 grid steps
    (so the 'parallel' axis can shard across v7x's two TensorCores)."""
    half = -(-batch // 2)                      # ceil(batch / 2)
    return int(min(max_tile, max(16, -(-half // 16) * 16)))


def reducer_forward_batched(left, right, tracking, area_attn_evc, params,
                            *, max_tile_b=MAX_TILE_B, vmem_limit_bytes=None):
    """Batched Reducer: B reduce compositions in one pallas_call.

    left, right: (B, 2H); tracking: (B, H); area_attn_evc: (B, NUM_EDU, E).
    Returns (hc: (B, 2H) = [h | c], angle_prop_all: (B, 3)).
    """
    H, E, NE = HIDDEN_SIZE, EMBED_SIZE, NUM_EDU
    f32, bf16 = jnp.float32, jnp.bfloat16
    B = left.shape[0]

    # bf16 at the kernel boundary halves the dominant HBM read; compute stays f32.
    left = left.reshape(B, 2 * H).astype(bf16)
    right = right.reshape(B, 2 * H).astype(bf16)
    tracking = tracking.reshape(B, H).astype(bf16)
    area = area_attn_evc.reshape(B, NE * E).astype(bf16)     # lane-dense 256

    tile_b = _choose_tile_b(B, max_tile_b)
    Bp = tile_b * pl.cdiv(B, tile_b)
    if Bp != B:
        pb = Bp - B
        left = jnp.pad(left, ((0, pb), (0, 0)))
        right = jnp.pad(right, ((0, pb), (0, 0)))
        tracking = jnp.pad(tracking, ((0, pb), (0, 0)))
        area = jnp.pad(area, ((0, pb), (0, 0)))

    # Constant replication / 0-1 selection matrices (resident in VMEM).
    w_attn_rep = jnp.tile(params["w_attn"].astype(f32), (1, NE))      # (H, NE*E)
    s_sum = jnp.repeat(jnp.eye(NE, dtype=f32), E, axis=0)             # (NE*E, NE)
    s_expand = s_sum.T                                                # (NE, NE*E)
    s_ctx = jnp.tile(jnp.eye(E, dtype=f32), (NE, 1))                  # (NE*E, E)

    grid = (Bp // tile_b,)
    const = lambda i: (0, 0)

    hc, angles = pl.pallas_call(
        reducer_kernel,
        out_shape=(jax.ShapeDtypeStruct((Bp, 2 * H), f32),
                   jax.ShapeDtypeStruct((Bp, 3), f32)),
        grid=grid,
        in_specs=[
            # activations: tiled along the batch axis (bf16)
            pl.BlockSpec((tile_b, 2 * H), lambda i: (i, 0)),
            pl.BlockSpec((tile_b, 2 * H), lambda i: (i, 0)),
            pl.BlockSpec((tile_b, H), lambda i: (i, 0)),
            pl.BlockSpec((tile_b, NE * E), lambda i: (i, 0)),
            # weights / selection matrices: constant index maps -> resident
            pl.BlockSpec((H, NE * E), const),
            pl.BlockSpec((NE * E, NE), const),
            pl.BlockSpec((NE, NE * E), const),
            pl.BlockSpec((NE * E, E), const),
            pl.BlockSpec((CONCAT, 3), const),
            pl.BlockSpec((1, 3), const),
            pl.BlockSpec((CONCAT, 5 * H), const),
            pl.BlockSpec((1, 5 * H), const),
        ],
        out_specs=[pl.BlockSpec((tile_b, 2 * H), lambda i: (i, 0)),
                   pl.BlockSpec((tile_b, 3), lambda i: (i, 0))],
        compiler_params=pltpu.CompilerParams(
            dimension_semantics=("parallel",),
            vmem_limit_bytes=vmem_limit_bytes),   # bump on v5e if tile >= 2048
    )(left, right, tracking, area,
      w_attn_rep, s_sum, s_expand, s_ctx,
      params["w_gate"], params["b_gate"], params["w_proj"], params["b_proj"])

    return hc[:B], angles[:B]


def reducer_forward(left, right, tracking, area_attn_evc, params):
    """Single-node wrapper matching the reference signature (B = 1)."""
    hc, angles = reducer_forward_batched(
        left.reshape(1, -1), right.reshape(1, -1),
        tracking.reshape(1, -1), area_attn_evc[None], params)
    return hc[0], angles[0]


if __name__ == "__main__":
    key = jax.random.PRNGKey(0)
    kp, kl, kr, kt, ka = jax.random.split(key, 5)

    B = 64  # small batch of reduce ops; tile chooser keeps 2 grid steps
    params = init_params(kp)
    left = jax.random.normal(kl, (B, 2 * HIDDEN_SIZE), jnp.float32)
    right = jax.random.normal(kr, (B, 2 * HIDDEN_SIZE), jnp.float32)
    tracking = jax.random.normal(kt, (B, HIDDEN_SIZE), jnp.float32)
    area_attn_evc = jax.random.normal(ka, (B, NUM_EDU, EMBED_SIZE), jnp.float32)

    hc, angle_prop_all = reducer_forward_batched(
        left, right, tracking, area_attn_evc, params)
    jax.block_until_ready((hc, angle_prop_all))

    assert hc.shape == (B, 2 * HIDDEN_SIZE)
    assert angle_prop_all.shape == (B, 3)
    assert bool(jnp.all(jnp.isfinite(hc)))
    assert bool(jnp.all(jnp.isfinite(angle_prop_all)))
    # gate angles are a softmax; approx EUP reciprocal -> rows sum to ~1 (1e-3 level)
    assert bool(jnp.allclose(jnp.sum(angle_prop_all, axis=1), 1.0, atol=5e-3))

    # single-node path (reference signature) still works and matches
    hc1, ang1 = reducer_forward(left[0], right[0], tracking[0:1],
                                area_attn_evc[0], params)
    jax.block_until_ready((hc1, ang1))
    assert hc1.shape == (2 * HIDDEN_SIZE,) and ang1.shape == (3,)
    assert bool(jnp.allclose(hc1, hc[0], atol=1e-4))

    print("KERNEL_OK")
</pallas_src>

<mosaic_0001>
module attributes {stable_mosaic.version = 11 : i64} {
  func.func @reducer_kernel(%arg0: i32, %arg1: memref<32x64xbf16, #tpu.memory_space<vmem>>, %arg2: memref<32x64xbf16, #tpu.memory_space<vmem>>, %arg3: memref<32x32xbf16, #tpu.memory_space<vmem>>, %arg4: memref<32x256xbf16, #tpu.memory_space<vmem>>, %arg5: memref<32x256xf32, #tpu.memory_space<vmem>>, %arg6: memref<256x8xf32, #tpu.memory_space<vmem>>, %arg7: memref<8x256xf32, #tpu.memory_space<vmem>>, %arg8: memref<256x32xf32, #tpu.memory_space<vmem>>, %arg9: memref<128x3xf32, #tpu.memory_space<vmem>>, %arg10: memref<1x3xf32, #tpu.memory_space<vmem>>, %arg11: memref<128x160xf32, #tpu.memory_space<vmem>>, %arg12: memref<1x160xf32, #tpu.memory_space<vmem>>, %arg13: memref<32x64xf32, #tpu.memory_space<vmem>>, %arg14: memref<32x3xf32, #tpu.memory_space<vmem>>) attributes {dimension_semantics = [#tpu.dimension_semantics<parallel>], iteration_bounds = array<i64: 2>, scalar_prefetch = 0 : i64, scratch_operands = 0 : i64, tpu.core_type = #tpu.core_type<tc>, window_params = [{transform_indices = @transform_0, window_bounds = array<i64: 32, 64>}, {transform_indices = @transform_1, window_bounds = array<i64: 32, 64>}, {transform_indices = @transform_2, window_bounds = array<i64: 32, 32>}, {transform_indices = @transform_3, window_bounds = array<i64: 32, 256>}, {pipeline_mode = #tpu.pipeline_mode<synchronous>, transform_indices = @transform_4, window_bounds = array<i64: 32, 256>}, {pipeline_mode = #tpu.pipeline_mode<synchronous>, transform_indices = @transform_5, window_bounds = array<i64: 256, 8>}, {pipeline_mode = #tpu.pipeline_mode<synchronous>, transform_indices = @transform_6, window_bounds = array<i64: 8, 256>}, {pipeline_mode = #tpu.pipeline_mode<synchronous>, transform_indices = @transform_7, window_bounds = array<i64: 256, 32>}, {pipeline_mode = #tpu.pipeline_mode<synchronous>, transform_indices = @transform_8, window_bounds = array<i64: 128, 3>}, {pipeline_mode = #tpu.pipeline_mode<synchronous>, transform_indices = @transform_9, window_bounds = array<i64: 1, 3>}, {pipeline_mode = #tpu.pipeline_mode<synchronous>, transform_indices = @transform_10, window_bounds = array<i64: 128, 160>}, {pipeline_mode = #tpu.pipeline_mode<synchronous>, transform_indices = @transform_11, window_bounds = array<i64: 1, 160>}, {transform_indices = @transform_12, window_bounds = array<i64: 32, 64>}, {transform_indices = @transform_13, window_bounds = array<i64: 32, 3>}]} {
    %c0 = arith.constant 0 : index
    %c0_0 = arith.constant 0 : index
    %0 = vector.load %arg1[%c0, %c0_0] : memref<32x64xbf16, #tpu.memory_space<vmem>>, vector<32x64xbf16>
    %1 = arith.extf %0 : vector<32x64xbf16> to vector<32x64xf32>
    %c0_1 = arith.constant 0 : index
    %c0_2 = arith.constant 0 : index
    %2 = vector.load %arg2[%c0_1, %c0_2] : memref<32x64xbf16, #tpu.memory_space<vmem>>, vector<32x64xbf16>
    %3 = arith.extf %2 : vector<32x64xbf16> to vector<32x64xf32>
    %c0_3 = arith.constant 0 : index
    %c0_4 = arith.constant 0 : index
    %4 = vector.load %arg3[%c0_3, %c0_4] : memref<32x32xbf16, #tpu.memory_space<vmem>>, vector<32x32xbf16>
    %5 = arith.extf %4 : vector<32x32xbf16> to vector<32x32xf32>
    %c0_5 = arith.constant 0 : index
    %c0_6 = arith.constant 0 : index
    %6 = vector.load %arg4[%c0_5, %c0_6] : memref<32x256xbf16, #tpu.memory_space<vmem>>, vector<32x256xbf16>
    %7 = arith.extf %6 : vector<32x256xbf16> to vector<32x256xf32>
    %8 = vector.extract_strided_slice %1 {offsets = [0, 0], sizes = [32, 32], strides = [1, 1]} : vector<32x64xf32> to vector<32x32xf32>
    %9 = vector.extract_strided_slice %1 {offsets = [0, 32], sizes = [32, 32], strides = [1, 1]} : vector<32x64xf32> to vector<32x32xf32>
    %10 = vector.extract_strided_slice %3 {offsets = [0, 0], sizes = [32, 32], strides = [1, 1]} : vector<32x64xf32> to vector<32x32xf32>
    %11 = vector.extract_strided_slice %3 {offsets = [0, 32], sizes = [32, 32], strides = [1, 1]} : vector<32x64xf32> to vector<32x32xf32>
    %c0_7 = arith.constant 0 : index
    %c0_8 = arith.constant 0 : index
    %12 = vector.load %arg5[%c0_7, %c0_8] : memref<32x256xf32, #tpu.memory_space<vmem>>, vector<32x256xf32>
    %cst = arith.constant dense<0.000000e+00> : vector<32x256xf32>
    %13 = tpu.matmul %5, %12, %cst {dimension_numbers = #tpu.dot_dimension_numbers<[1], [0], [0], [1], [0, 0, 1, 1], [], []>} : vector<32x32xf32>, vector<32x256xf32>, vector<32x256xf32> -> vector<32x256xf32>
    %14 = arith.mulf %7, %13 : vector<32x256xf32>
    %c0_9 = arith.constant 0 : index
    %c0_10 = arith.constant 0 : index
    %15 = vector.load %arg6[%c0_9, %c0_10] : memref<256x8xf32, #tpu.memory_space<vmem>>, vector<256x8xf32>
    %cst_11 = arith.constant dense<0.000000e+00> : vector<32x8xf32>
    %16 = tpu.matmul %14, %15, %cst_11 {dimension_numbers = #tpu.dot_dimension_numbers<[1], [0], [0], [1], [0, 0, 1, 1], [], []>} : vector<32x256xf32>, vector<256x8xf32>, vector<32x8xf32> -> vector<32x8xf32>
    %cst_12 = arith.constant dense<0xFF800000> : vector<32xf32>
    %17 = vector.multi_reduction <maximumf>, %16, %cst_12 [1] : vector<32x8xf32> to vector<32xf32>
    %18 = vector.shape_cast %17 : vector<32xf32> to vector<32x1xf32>
    %19 = vector.broadcast %18 : vector<32x1xf32> to vector<32x8xf32>
    %20 = arith.subf %16, %19 : vector<32x8xf32>
    %21 = math.exp %20 : vector<32x8xf32>
    %cst_13 = arith.constant dense<0.000000e+00> : vector<32xf32>
    %22 = vector.multi_reduction <add>, %21, %cst_13 [1] : vector<32x8xf32> to vector<32xf32>
    %23 = vector.shape_cast %22 : vector<32xf32> to vector<32x1xf32>
    %24 = tpu.reciprocal %23 {approx = true} : vector<32x1xf32> -> vector<32x1xf32>
    %25 = vector.broadcast %24 : vector<32x1xf32> to vector<32x8xf32>
    %26 = arith.mulf %21, %25 : vector<32x8xf32>
    %c0_14 = arith.constant 0 : index
    %c0_15 = arith.constant 0 : index
    %27 = vector.load %arg7[%c0_14, %c0_15] : memref<8x256xf32, #tpu.memory_space<vmem>>, vector<8x256xf32>
    %cst_16 = arith.constant dense<0.000000e+00> : vector<32x256xf32>
    %28 = tpu.matmul %26, %27, %cst_16 {dimension_numbers = #tpu.dot_dimension_numbers<[1], [0], [0], [1], [0, 0, 1, 1], [], []>} : vector<32x8xf32>, vector<8x256xf32>, vector<32x256xf32> -> vector<32x256xf32>
    %29 = arith.mulf %28, %7 : vector<32x256xf32>
    %c0_17 = arith.constant 0 : index
    %c0_18 = arith.constant 0 : index
    %30 = vector.load %arg8[%c0_17, %c0_18] : memref<256x32xf32, #tpu.memory_space<vmem>>, vector<256x32xf32>
    %cst_19 = arith.constant dense<0.000000e+00> : vector<32x32xf32>
    %31 = tpu.matmul %29, %30, %cst_19 {dimension_numbers = #tpu.dot_dimension_numbers<[1], [0], [0], [1], [0, 0, 1, 1], [], []>} : vector<32x256xf32>, vector<256x32xf32>, vector<32x32xf32> -> vector<32x32xf32>
    %32 = tpu.concatenate %5, %8, %10, %31 in 1 : vector<32x32xf32>, vector<32x32xf32>, vector<32x32xf32>, vector<32x32xf32> -> vector<32x128xf32>
    %c0_20 = arith.constant 0 : index
    %c0_21 = arith.constant 0 : index
    %33 = vector.load %arg9[%c0_20, %c0_21] : memref<128x3xf32, #tpu.memory_space<vmem>>, vector<128x3xf32>
    %cst_22 = arith.constant dense<0.000000e+00> : vector<32x3xf32>
    %34 = tpu.matmul %32, %33, %cst_22 {dimension_numbers = #tpu.dot_dimension_numbers<[1], [0], [0], [1], [0, 0, 1, 1], [], []>} : vector<32x128xf32>, vector<128x3xf32>, vector<32x3xf32> -> vector<32x3xf32>
    %c0_23 = arith.constant 0 : index
    %c0_24 = arith.constant 0 : index
    %35 = vector.load %arg10[%c0_23, %c0_24] : memref<1x3xf32, #tpu.memory_space<vmem>>, vector<1x3xf32>
    %36 = vector.broadcast %35 : vector<1x3xf32> to vector<32x3xf32>
    %37 = arith.addf %34, %36 : vector<32x3xf32>
    %cst_25 = arith.constant dense<0xFF800000> : vector<32xf32>
    %38 = vector.multi_reduction <maximumf>, %37, %cst_25 [1] : vector<32x3xf32> to vector<32xf32>
    %39 = vector.shape_cast %38 : vector<32xf32> to vector<32x1xf32>
    %40 = vector.broadcast %39 : vector<32x1xf32> to vector<32x3xf32>
    %41 = arith.subf %37, %40 : vector<32x3xf32>
    %42 = math.exp %41 : vector<32x3xf32>
    %cst_26 = arith.constant dense<0.000000e+00> : vector<32xf32>
    %43 = vector.multi_reduction <add>, %42, %cst_26 [1] : vector<32x3xf32> to vector<32xf32>
    %44 = vector.shape_cast %43 : vector<32xf32> to vector<32x1xf32>
    %45 = tpu.reciprocal %44 {approx = true} : vector<32x1xf32> -> vector<32x1xf32>
    %46 = vector.broadcast %45 : vector<32x1xf32> to vector<32x3xf32>
    %47 = arith.mulf %42, %46 : vector<32x3xf32>
    %48 = vector.extract_strided_slice %47 {offsets = [0, 0], sizes = [32, 1], strides = [1, 1]} : vector<32x3xf32> to vector<32x1xf32>
    %49 = vector.extract_strided_slice %47 {offsets = [0, 1], sizes = [32, 1], strides = [1, 1]} : vector<32x3xf32> to vector<32x1xf32>
    %50 = vector.extract_strided_slice %47 {offsets = [0, 2], sizes = [32, 1], strides = [1, 1]} : vector<32x3xf32> to vector<32x1xf32>
    %51 = tpu.iota {dimensions = array<i32: 1>} : vector<32x128xi32>
    %c32_i32 = arith.constant 32 : i32
    %52 = vector.broadcast %c32_i32 : i32 to vector<32x128xi32>
    %53 = arith.cmpi slt, %51, %52 : vector<32x128xi32>
    %c96_i32 = arith.constant 96 : i32
    %54 = vector.broadcast %c96_i32 : i32 to vector<32x128xi32>
    %55 = arith.cmpi slt, %51, %54 : vector<32x128xi32>
    %56 = vector.shape_cast %49 : vector<32x1xf32> to vector<32x1xf32>
    %57 = vector.broadcast %56 : vector<32x1xf32> to vector<32x128xf32>
    %58 = vector.shape_cast %50 : vector<32x1xf32> to vector<32x1xf32>
    %59 = vector.broadcast %58 : vector<32x1xf32> to vector<32x128xf32>
    %60 = arith.select %55, %57, %59 : vector<32x128xi1>, vector<32x128xf32>
    %61 = vector.shape_cast %48 : vector<32x1xf32> to vector<32x1xf32>
    %62 = vector.broadcast %61 : vector<32x1xf32> to vector<32x128xf32>
    %63 = arith.select %53, %62, %60 : vector<32x128xi1>, vector<32x128xf32>
    %64 = arith.mulf %32, %63 : vector<32x128xf32>
    %c0_27 = arith.constant 0 : index
    %c0_28 = arith.constant 0 : index
    %65 = vector.load %arg11[%c0_27, %c0_28] : memref<128x160xf32, #tpu.memory_space<vmem>>, vector<128x160xf32>
    %cst_29 = arith.constant dense<0.000000e+00> : vector<32x160xf32>
    %66 = tpu.matmul %64, %65, %cst_29 {dimension_numbers = #tpu.dot_dimension_numbers<[1], [0], [0], [1], [0, 0, 1, 1], [], []>} : vector<32x128xf32>, vector<128x160xf32>, vector<32x160xf32> -> vector<32x160xf32>
    %c0_30 = arith.constant 0 : index
    %c0_31 = arith.constant 0 : index
    %67 = vector.load %arg12[%c0_30, %c0_31] : memref<1x160xf32, #tpu.memory_space<vmem>>, vector<1x160xf32>
    %68 = vector.broadcast %67 : vector<1x160xf32> to vector<32x160xf32>
    %69 = arith.addf %66, %68 : vector<32x160xf32>
    %70 = vector.extract_strided_slice %69 {offsets = [0, 0], sizes = [32, 32], strides = [1, 1]} : vector<32x160xf32> to vector<32x32xf32>
    %71 = vector.extract_strided_slice %69 {offsets = [0, 32], sizes = [32, 32], strides = [1, 1]} : vector<32x160xf32> to vector<32x32xf32>
    %72 = vector.extract_strided_slice %69 {offsets = [0, 64], sizes = [32, 32], strides = [1, 1]} : vector<32x160xf32> to vector<32x32xf32>
    %73 = vector.extract_strided_slice %69 {offsets = [0, 96], sizes = [32, 32], strides = [1, 1]} : vector<32x160xf32> to vector<32x32xf32>
    %74 = vector.extract_strided_slice %69 {offsets = [0, 128], sizes = [32, 32], strides = [1, 1]} : vector<32x160xf32> to vector<32x32xf32>
    %75 = math.tanh %70 : vector<32x32xf32>
    %76 = arith.negf %71 : vector<32x32xf32>
    %77 = math.exp %76 : vector<32x32xf32>
    %cst_32 = arith.constant 1.000000e+00 : f32
    %78 = vector.broadcast %cst_32 : f32 to vector<32x32xf32>
    %79 = arith.addf %78, %77 : vector<32x32xf32>
    %80 = arith.divf %78, %79 : vector<32x32xf32>
    %81 = arith.mulf %75, %80 : vector<32x32xf32>
    %82 = arith.negf %72 : vector<32x32xf32>
    %83 = math.exp %82 : vector<32x32xf32>
    %cst_33 = arith.constant 1.000000e+00 : f32
    %84 = vector.broadcast %cst_33 : f32 to vector<32x32xf32>
    %85 = arith.addf %84, %83 : vector<32x32xf32>
    %86 = arith.divf %84, %85 : vector<32x32xf32>
    %87 = arith.mulf %86, %9 : vector<32x32xf32>
    %88 = arith.addf %81, %87 : vector<32x32xf32>
    %89 = arith.negf %73 : vector<32x32xf32>
    %90 = math.exp %89 : vector<32x32xf32>
    %cst_34 = arith.constant 1.000000e+00 : f32
    %91 = vector.broadcast %cst_34 : f32 to vector<32x32xf32>
    %92 = arith.addf %91, %90 : vector<32x32xf32>
    %93 = arith.divf %91, %92 : vector<32x32xf32>
    %94 = arith.mulf %93, %11 : vector<32x32xf32>
    %95 = arith.addf %88, %94 : vector<32x32xf32>
    %96 = arith.negf %74 : vector<32x32xf32>
    %97 = math.exp %96 : vector<32x32xf32>
    %cst_35 = arith.constant 1.000000e+00 : f32
    %98 = vector.broadcast %cst_35 : f32 to vector<32x32xf32>
    %99 = arith.addf %98, %97 : vector<32x32xf32>
    %100 = arith.divf %98, %99 : vector<32x32xf32>
    %101 = math.tanh %95 : vector<32x32xf32>
    %102 = arith.mulf %100, %101 : vector<32x32xf32>
    %103 = tpu.concatenate %102, %95 in 1 : vector<32x32xf32>, vector<32x32xf32> -> vector<32x64xf32>
    %c0_36 = arith.constant 0 : index
    %c0_37 = arith.constant 0 : index
    %104 = vector.load %arg13[%c0_36, %c0_37] : memref<32x64xf32, #tpu.memory_space<vmem>>, vector<32x64xf32>
    tpu.vector_store %arg13[%c0_36, %c0_37], %103 {strides = array<i32>} : memref<32x64xf32, #tpu.memory_space<vmem>>, vector<32x64xf32>,
    %c0_38 = arith.constant 0 : index
    %c0_39 = arith.constant 0 : index
    %105 = vector.load %arg14[%c0_38, %c0_39] : memref<32x3xf32, #tpu.memory_space<vmem>>, vector<32x3xf32>
    tpu.vector_store %arg14[%c0_38, %c0_39], %47 {strides = array<i32>} : memref<32x3xf32, #tpu.memory_space<vmem>>, vector<32x3xf32>,
    return
  }
  func.func @transform_0(%arg0: i32) -> (i32, i32) {
    %c0_i32 = arith.constant 0 : i32
    %c0_i32_0 = arith.constant 0 : i32
    return %arg0, %c0_i32 : i32, i32
  }
  func.func @transform_1(%arg0: i32) -> (i32, i32) {
    %c0_i32 = arith.constant 0 : i32
    %c0_i32_0 = arith.constant 0 : i32
    return %arg0, %c0_i32 : i32, i32
  }
  func.func @transform_2(%arg0: i32) -> (i32, i32) {
    %c0_i32 = arith.constant 0 : i32
    %c0_i32_0 = arith.constant 0 : i32
    return %arg0, %c0_i32 : i32, i32
  }
  func.func @transform_3(%arg0: i32) -> (i32, i32) {
    %c0_i32 = arith.constant 0 : i32
    %c0_i32_0 = arith.constant 0 : i32
    return %arg0, %c0_i32 : i32, i32
  }
  func.func @transform_4(%arg0: i32) -> (i32, i32) {
    %c0_i32 = arith.constant 0 : i32
    %c0_i32_0 = arith.constant 0 : i32
    %c0_i32_1 = arith.constant 0 : i32
    return %c0_i32, %c0_i32_0 : i32, i32
  }
  func.func @transform_5(%arg0: i32) -> (i32, i32) {
    %c0_i32 = arith.constant 0 : i32
    %c0_i32_0 = arith.constant 0 : i32
    %c0_i32_1 = arith.constant 0 : i32
    return %c0_i32, %c0_i32_0 : i32, i32
  }
  func.func @transform_6(%arg0: i32) -> (i32, i32) {
    %c0_i32 = arith.constant 0 : i32
    %c0_i32_0 = arith.constant 0 : i32
    %c0_i32_1 = arith.constant 0 : i32
    return %c0_i32, %c0_i32_0 : i32, i32
  }
  func.func @transform_7(%arg0: i32) -> (i32, i32) {
    %c0_i32 = arith.constant 0 : i32
    %c0_i32_0 = arith.constant 0 : i32
    %c0_i32_1 = arith.constant 0 : i32
    return %c0_i32, %c0_i32_0 : i32, i32
  }
  func.func @transform_8(%arg0: i32) -> (i32, i32) {
    %c0_i32 = arith.constant 0 : i32
    %c0_i32_0 = arith.constant 0 : i32
    %c0_i32_1 = arith.constant 0 : i32
    return %c0_i32, %c0_i32_0 : i32, i32
  }
  func.func @transform_9(%arg0: i32) -> (i32, i32) {
    %c0_i32 = arith.constant 0 : i32
    %c0_i32_0 = arith.constant 0 : i32
    %c0_i32_1 = arith.constant 0 : i32
    return %c0_i32, %c0_i32_0 : i32, i32
  }
  func.func @transform_10(%arg0: i32) -> (i32, i32) {
    %c0_i32 = arith.constant 0 : i32
    %c0_i32_0 = arith.constant 0 : i32
    %c0_i32_1 = arith.constant 0 : i32
    return %c0_i32, %c0_i32_0 : i32, i32
  }
  func.func @transform_11(%arg0: i32) -> (i32, i32) {
    %c0_i32 = arith.constant 0 : i32
    %c0_i32_0 = arith.constant 0 : i32
    %c0_i32_1 = arith.constant 0 : i32
    return %c0_i32, %c0_i32_0 : i32, i32
  }
  func.func @transform_12(%arg0: i32) -> (i32, i32) {
    %c0_i32 = arith.constant 0 : i32
    %c0_i32_0 = arith.constant 0 : i32
    return %arg0, %c0_i32 : i32, i32
  }
  func.func @transform_13(%arg0: i32) -> (i32, i32) {
    %c0_i32 = arith.constant 0 : i32
    %c0_i32_0 = arith.constant 0 : i32
    return %arg0, %c0_i32 : i32, i32
  }
}

</mosaic_0001>

<bundles_post_ra>
// kernel: tpu_custom_call.1
= control target key start
LH: loop header
LB: loop body
LE: loop exit
PB: predicated region body
PF: predicated region fallthrough
CT: control target
= control target key end

     0   :  { %s3205_s0 = inlined_call_operand.vmem [shape: bf16[64,64], index: 0, kind: input, shape index: {}]   ;;  %s3206_s1 = inlined_call_operand.vmem [shape: bf16[64,64], index: 1, kind: input, shape index: {}]   ;;  %s3207_s2 = inlined_call_operand.vmem [shape: bf16[64,32], index: 2, kind: input, shape index: {}]   ;;  %s3208_s3 = inlined_call_operand.vmem [shape: bf16[64,256], index: 3, kind: input, shape index: {}]   ;;  %s3209_s4 = inlined_call_operand.vmem [shape: f32[32,256], index: 4, kind: input, shape index: {}]   ;;  %s3210_s5 = inlined_call_operand.vmem [shape: f32[256,8], index: 5, kind: input, shape index: {}]   ;;  %s3211_s6 = inlined_call_operand.vmem [shape: f32[8,256], index: 6, kind: input, shape index: {}]   ;;  %s3212_s7 = inlined_call_operand.vmem [shape: f32[256,32], index: 7, kind: input, shape index: {}]   ;;  %s3213_s8 = inlined_call_operand.vmem [shape: f32[128,3], index: 8, kind: input, shape index: {}]   ;;  %s3214_s9 = inlined_call_operand.vmem [shape: f32[1,3], index: 9, kind: input, shape index: {}]   ;;  %s3215_s10 = inlined_call_operand.vmem [shape: f32[128,160], index: 10, kind: input, shape index: {}]   ;;  %s3216_s11 = inlined_call_operand.vmem [shape: f32[1,160], index: 11, kind: input, shape index: {}]   ;;  %s3217_s12 = inlined_call_operand.hbm [shape: f32[64,64], index: 12, kind: output, shape index: {0}]   ;;  %s3218_s13 = inlined_call_operand.vmem [shape: f32[64,3], index: 13, kind: output, shape index: {1}]  }
   0x1   :  { %3228 = sst [smem:[#allocation9_spill]] %s3209_s4 }
   0x2   :  { %19 = vsyncpa [#allocation3], 0 }
   0x3   :  { %21 = vsyncpa [#allocation3 + $0x1], 0  ;;  %s2439_s25 = smov 0   ;;  %s2441_s26 = smov 0  }
   0x4   :  { %s2443_s27 = smov 0   ;;  %s2445_s28 = smov 0  }
   0x5 LB: > { %3229 = sst [smem:[#allocation5_spill]] %s2353_s27  ;;  %s2460_s29 = sadd.s32 4294967295, %s2357_s28   ;;  %s2357_s28 = sphi %s2445_s28, %s3240_s28   ;;  %s2353_s27 = sphi %s2443_s27, %s3242_s27   ;;  %s2349_s26 = sphi %s2441_s26, %s3244_s26   ;;  %s2345_s25 = sphi %s2439_s25, %s3243_s25  }
   0x6   : > { %s1787_s30 = sadd.s32 4294967294, %s2357_s28   ;;  %s2464_s14 = sadd.s32 1, %s2357_s28  }
   0x7   : > { %3230 = sst [smem:[#allocation6_spill]] %s2464_s14  ;;  %s306_s15 = sadd.s32 1, %s2353_s27 }
   0x8   : > { %s303_s16 = ssub.s32 %s2357_s28, %s2464_s14  ;;  %p316_p0 = scmp.ne.s32.totalorder %s2353_s27, %s2349_s26 }
   0x9   : > { %p304_p1 = scmp.eq.s32.totalorder %s303_s16, 0  ;;  %p317_p2 = scmp.eq.s32.totalorder %s2460_s29, 1 }
   0xa   : > { %p322_p3 = scmp.ne.s32.totalorder %s2349_s26, %s2345_s25  ;;  %p323_p4 = scmp.eq.s32.totalorder %s1787_s30, 1 }
   0xb   : > { %s2475_s17 = scalar_select %p304_p1, %s2353_s27, %s306_s15  }
   0xc   : > { %p2477_p5 = por %p317_p2, %p316_p0  ;;  %p2481_p6 = por %p323_p4, %p322_p3 }
   0xd   : > { %3231 = sst [smem:[#allocation7_spill]] %s2475_s17  ;;  %p1790_p7 = scmp.ge.s32.totalorder %s2357_s28, 1 }
   0xe   : > { %s3233_s19 = scalar_select %p2481_p6, 1, 0 }
   0xf   : > { %p428_p8 = scmp.lt.s32.totalorder %s2357_s28, 3 }
  0x10   : > { %3234 = sst [smem:[#allocation8_spill]] %s3233_s19 }
  0x11   : > { %p429_p9 = pnand %p1790_p7, %p428_p8 }
  0x12   : > { %s3235_s4 = sld [smem:[#allocation9_spill]] (!%p429_p9)  ;;  %s1792_s15 = sshll.u32 (!%p429_p9), %s2460_s29, 2  ;;  %v2359_v7 = vmov (!%p429_p9), 0.0   ;;  %v695_v12 = vld [vmem:[%s3210_s5 + $0x80] sm:$0xff] (!%p429_p9)  ;;  %v696_v13 = vld [vmem:[%s3210_s5 + $0x88] sm:$0xff] (!%p429_p9)  ;;  %v697_v18 = vld [vmem:[%s3210_s5 + $0x90] sm:$0xff] (!%p429_p9) }
  0x13   : > { %432 = sbr.rel (%p429_p9) target bundleno = 2527 (0x9df), region = 68  ;;  %646 = vmatprep.mubr.f32.mxu1 (!%p429_p9), %v2359_v7  ;;  %p494_p10 = scmp.lt.s32.totalorder (!%p429_p9), %s1792_s15, 7  ;;  %919 = vmatprep.mubr.f32.mxu0 (!%p429_p9), %v2359_v7  ;;  %v2008_v15 = vpack.c.bf16 (!%p429_p9), %v696_v13, %v695_v12  ;;  %v679_v16 = vld [vmem:[%s3210_s5] sm:$0xff] (!%p429_p9)  ;;  %v680_v17 = vld [vmem:[%s3210_s5 + $0x8] sm:$0xff] (!%p429_p9)  ;;  %v698_v19 = vld [vmem:[%s3210_s5 + $0x98] sm:$0xff] (!%p429_p9)  ;;  %vm569_vm0 = vcmask (!%p429_p9), 261120  }
  0x14   : > { %v2010_v22 = vpack.c.bf16 (!%p429_p9), %v680_v17, %v679_v16  ;;  %v2012_v23 = vpack.c.bf16 (!%p429_p9), %v698_v19, %v697_v18  ;;  %v681_v24 = vld [vmem:[%s3210_s5 + $0x10] sm:$0xff] (!%p429_p9)  ;;  %v682_v25 = vld [vmem:[%s3210_s5 + $0x18] sm:$0xff] (!%p429_p9)  ;;  %v699_v26 = vld [vmem:[%s3210_s5 + $0xa0] sm:$0xff] (!%p429_p9)  ;;  %vm796_vm1 = vcmask (!%p429_p9), 64512   ;;  %s3224_s17 = smov (!%p429_p9), 32   ;;  %s3226_s19 = smov (!%p429_p9), 64  }
  0x15   : > { %v700_v27 = vld [vmem:[%s3210_s5 + $0xa8] sm:$0xff] (!%p429_p9)  ;;  %v2014_v30 = vpack.c.bf16 (!%p429_p9), %v682_v25, %v681_v24  ;;  %v683_v32 = vld [vmem:[%s3210_s5 + $0x20] sm:$0xff] (!%p429_p9)  ;;  %v701_v34 = vld [vmem:[%s3210_s5 + $0xb0] sm:$0xff] (!%p429_p9)  ;;  %vm1121_vm2 = vcmask (!%p429_p9), 523264   ;;  %vm1126_vm3 = vcmask (!%p429_p9), 785408   ;;  %vm1239_vm4 = vcmask (!%p429_p9), 23552  }
  0x16   : > { %v2016_v31 = vpack.c.bf16 (!%p429_p9), %v700_v27, %v699_v26  ;;  %v684_v33 = vld [vmem:[%s3210_s5 + $0x28] sm:$0xff] (!%p429_p9)  ;;  %v702_v35 = vld [vmem:[%s3210_s5 + $0xb8] sm:$0xff] (!%p429_p9)  ;;  %v685_v39 = vld [vmem:[%s3210_s5 + $0x30] sm:$0xff] (!%p429_p9)  ;;  %s1826_s16 = sshll.u32 (!%p429_p9), %s2460_s29, 9  ;;  %s2366_s29 = smov (!%p429_p9), [#allocation2]  }
  0x17   : > { %v2018_v37 = vpack.c.bf16 (!%p429_p9), %v684_v33, %v683_v32  ;;  %v2020_v38 = vpack.c.bf16 (!%p429_p9), %v702_v35, %v701_v34  ;;  %v686_v40 = vld [vmem:[%s3210_s5 + $0x38] sm:$0xff] (!%p429_p9)  ;;  %v703_v41 = vld [vmem:[%s3210_s5 + $0xc0] sm:$0xff] (!%p429_p9)  ;;  %v704_v42 = vld [vmem:[%s3210_s5 + $0xc8] sm:$0xff] (!%p429_p9)  ;;  %s2299_s24 = sshll.u32 (!%p429_p9), %s2366_s29, 4  ;;  %s2300_s24 = int_to_ptr.vmem [resolvable:$false] %s2299_s24 }
  0x18   : > { %v562_v0 = vld [vmem:[%s3235_s4 + $0x8] sm:$0xff] (!%p429_p9)  ;;  %v564_v1 = vld [vmem:[%s3235_s4 + $0x18] sm:$0xff] (!%p429_p9)  ;;  %v561_v2 = vld [vmem:[%s3235_s4] sm:$0xff] (!%p429_p9)  ;;  %v2022_v44 = vpack.c.bf16 (!%p429_p9), %v686_v40, %v685_v39  ;;  %v2024_v45 = vpack.c.bf16 (!%p429_p9), %v704_v42, %v703_v41 }
  0x19   : > { %v2000_v3 = vpack.c.bf16 (!%p429_p9), %v564_v1, %v562_v0  ;;  %v563_v4 = vld [vmem:[%s3235_s4 + $0x10] sm:$0xff] (!%p429_p9)  ;;  %v566_v5 = vld [vmem:[%s3235_s4 + $0x28] sm:$0xff] (!%p429_p9)  ;;  %v568_v6 = vld [vmem:[%s3235_s4 + $0x38] sm:$0xff] (!%p429_p9) }
  0x1a   : > { %v2002_v8 = vpack.c.bf16 %v563_v4, %v561_v2  ;;  %v2004_v9 = vpack.c.bf16 %v568_v6, %v566_v5  ;;  %v565_v10 = vld [vmem:[%s3235_s4 + $0x20] sm:$0xff]  ;;  %v567_v11 = vld [vmem:[%s3235_s4 + $0x30] sm:$0xff]  ;;  %s3246_s15 = smov (!%p494_p10, %s1792_s15), 7  ;;  %v688_v47 = vld [vmem:[%s3210_s5 + $0x48] sm:$0xff] }
  0x1b   : > { %2001 = vmatprep.subr.bf16.mxu1 %v2000_v3  ;;  %v2006_v14 = vpack.c.bf16 %v567_v11, %v565_v10  ;;  %s2523_s20 = sshll.u32 %s3246_s15, 2  ;;  %v687_v46 = vld [vmem:[%s3210_s5 + $0x40] sm:$0xff]  ;;  %v705_v48 = vld [vmem:[%s3210_s5 + $0xd0] sm:$0xff]  ;;  %v706_v49 = vld [vmem:[%s3210_s5 + $0xd8] sm:$0xff]  ;;  %s3223_s30 = sshll.u32 %s3246_s15, 3 }
  0x1c   : > { %2003 = vmatpush1.bf16.msra.mxu1 %v2002_v8  ;;  %s509_s14 = scalar_lea.vmem %s3207_s2, %s2523_s20  ;;  %v2026_v50 = vpack.c.bf16 %v688_v47, %v687_v46  ;;  %v2028_v51 = vpack.c.bf16 %v706_v49, %v705_v48  ;;  %v689_v52 = vld [vmem:[%s3210_s5 + $0x50] sm:$0xff]  ;;  %v690_v53 = vld [vmem:[%s3210_s5 + $0x58] sm:$0xff]  ;;  %v707_v54 = vld [vmem:[%s3210_s5 + $0xe0] sm:$0xff]  ;;  %s516_s22 = scalar_lea.vmem %s3208_s3, %s3223_s30 }
  0x1d   : > { %2005 = vmatprep.subr.bf16.mxu1 %v2004_v9  ;;  %v2541_v20 = vld [vmem:[%s509_s14] sm:$0xff]   ;;  %v2561_v29 = vld [vmem:[%s509_s14 + $0x8] sm:$0xff]   ;;  %v2030_v56 = vpack.c.bf16 %v690_v53, %v689_v52  ;;  %v709_v61 = vld [vmem:[%s3210_s5 + $0xf0] sm:$0xff]  ;;  %s2801_s23 = scalar_lea.vmem %s3205_s0, %s2523_s20  ;;  %s2826_s14 = scalar_lea.vmem %s3206_s1, %s2523_s20 }
  0x1e   : > { %v1845_v21 = vunpack.c.l.bf16 %v2541_v20  ;;  %v1846_v28 = vunpack.c.h.bf16 %v2541_v20  ;;  %v1849_v36 = vunpack.c.l.bf16 %v2561_v29  ;;  %v1850_v43 = vunpack.c.h.bf16 %v2561_v29  ;;  %v708_v55 = vld [vmem:[%s3210_s5 + $0xe8] sm:$0xff]  ;;  %v691_v58 = vld [vmem:[%s3210_s5 + $0x60] sm:$0xff]  ;;  %v710_v62 = vld [vmem:[%s3210_s5 + $0xf8] sm:$0xff]  ;;  %s2362_s20 = smov 96   ;;  %s3236_s30 = sshll.u32 %s3246_s15, 3 }
  0x1f   : > { %v2032_v57 = vpack.c.bf16 %v708_v55, %v707_v54  ;;  %v692_v59 = vld [vmem:[%s3210_s5 + $0x68] sm:$0xff]  ;;  %v2036_v63 = vpack.c.bf16 %v710_v62, %v709_v61  ;;  %v693_v0 = vld [vmem:[%s3210_s5 + $0x70] sm:$0xff]  ;;  %v694_v1 = vld [vmem:[%s3210_s5 + $0x78] sm:$0xff] }
  0x20   : > { %2007 = vmatpush1.bf16.msra.mxu1 %v2006_v14  ;;  %v2034_v60 = vpack.c.bf16 %v692_v59, %v691_v58  ;;  %v2038_v2 = vpack.c.bf16 %v694_v1, %v693_v0  ;;  %v2648_v3 = vld [vmem:[%s516_s22] sm:$0xff]  ;;  %v2652_v6 = vld [vmem:[%s516_s22 + $0x8] sm:$0xff]  ;;  %v2657_v12 = vld [vmem:[%s516_s22 + $0x10] sm:$0xff] }
  0x21   : > { %2009 = vmatprep.subr.bf16.mxu1 %v2008_v15  ;;  %v554_v4 = vunpack.c.h.bf16 %v2648_v3  ;;  %v553_v5 = vunpack.c.l.bf16 %v2648_v3  ;;  %v556_v11 = vunpack.c.h.bf16 %v2652_v6  ;;  %v555_v14 = vunpack.c.l.bf16 %v2652_v6 }
  0x22   : > { %v557_v17 = vunpack.c.l.bf16 %v2657_v12  ;;  %v558_v19 = vunpack.c.h.bf16 %v2657_v12  ;;  %v1836_v12 = vld [vmem:[%s2826_s14] sm:$0xff]  }
  0x23   : > { %1803 = vmatmul.mubr.msk.f32.vlgmr.msra.gmra.mrb[0].mxu1 %vm569_vm0, %v1845_v21 }
  0x24   : > { %652 = vmatprep.mubr.f32.mxu1 %v2359_v7  ;;  %2011 = vmatpush3.bf16.msra.mxu1 %v2010_v22  ;;  %v2666_v22 = vld [vmem:[%s516_s22 + $0x18] sm:$0xff] }
  0x25   : > { %2013 = vmatprep.subr.bf16.mxu1 %v2012_v23  ;;  %v559_v27 = vunpack.c.l.bf16 %v2666_v22 }
  0x27   : > { %1804 = vmatmul.mubr.msk.f32.gmra.mrb[2].mxu1 %vm569_vm0, %v1846_v28 }
  0x28   : > { %658 = vmatprep.mubr.f32.mxu1 %v2359_v7  ;;  %2015 = vmatpush3.bf16.msra.mxu1 %v2014_v30 }
  0x29   : > { %2017 = vmatprep.subr.bf16.mxu1 %v2016_v31  ;;  %v560_v31 = vunpack.c.h.bf16 %v2666_v22 }
  0x2b   : > { %1805 = vmatmul.mubr.msk.f32.gmra.mrb[4].mxu1 %vm569_vm0, %v1849_v36 }
  0x2c   : > { %664 = vmatprep.mubr.f32.mxu1 %v2359_v7  ;;  %2019 = vmatpush3.bf16.msra.mxu1 %v2018_v37 }
  0x2d   : > { %2021 = vmatprep.subr.bf16.mxu1 %v2020_v38 }
  0x2f   : > { %1806 = vmatmul.mubr.msk.f32.gmra.mrb[6].mxu1 %vm569_vm0, %v1850_v43 }
  0x30   : > { %2023 = vmatpush3.bf16.msra.mxu1 %v2022_v44 }
  0x31   : > { %2025 = vmatprep.subr.bf16.mxu1 %v2024_v45 }
  0x34   : > { %2027 = vmatpush3.bf16.msra.mxu1 %v2026_v50 }
  0x35   : > { %2029 = vmatprep.subr.bf16.mxu1 %v2028_v51 }
  0x38   : > { %2031 = vmatpush3.bf16.msra.mxu1 %v2030_v56 }
  0x39   : > { %2033 = vmatprep.subr.bf16.mxu1 %v2032_v57 }
  0x3c   : > { %2035 = vmatpush3.bf16.msra.mxu1 %v2034_v60 }
  0x3d   : > { %2037 = vmatprep.subr.bf16.mxu1 %v2036_v63 }
  0x40   : > { %2039 = vmatpush3.bf16.msra.mxu1 %v2038_v2 }
  0xf6   : > { %v648_v8 = vpop.f32.mrb[0].mxu1 }
  0xf7   : > { %v650_v9 = vpop.f32.mrb[1].mxu1  ;;  %v671_v13 = vmul.f32 %v648_v8, %v553_v5 }
  0xf8   : > { %v672_v10 = vmul.f32 %v650_v9, %v554_v4 }
  0xfa   : > { %v654_v15 = vpop.f32.mrb[2].mxu1  ;;  %775 = vmatprep.mubr.f32.mxu1 %v672_v10 }
  0xfb   : > { %v656_v16 = vpop.f32.mrb[3].mxu1  ;;  %776 = vmatmul.mubr.f32.vlgmr.msra.gmra.mrb[8].mxu1 %v671_v13  ;;  %v673_v23 = vmul.f32 %v654_v15, %v555_v14 }
  0xfc   : > { %v674_v18 = vmul.f32 %v656_v16, %v556_v11 }
  0xfe   : > { %v660_v24 = vpop.f32.mrb[4].mxu1  ;;  %780 = vmatprep.mubr.f32.mxu1 %v674_v18 }
  0xff   : > { %v675_v25 = vmul.f32 %v660_v24, %v557_v17  ;;  %v662_v26 = vpop.f32.mrb[5].mxu1  ;;  %781 = vmatmul.mubr.f32.gmra.mrb[10].mxu1 %v673_v23  ;;  %v842_v23 = vld [vmem:[%s3211_s6 + $0x8] sm:$0xff]  ;;  %v841_v24 = vld [vmem:[%s3211_s6] sm:$0xff] }
 0x100   : > { %v676_v30 = vmul.f32 %v662_v26, %v558_v19  ;;  %855 = vmatprep.subr.mxu0 %v842_v23  ;;  %v969_v26 = vld [vmem:[%s3212_s7 + $0x88] sm:$0xff]  ;;  %v979_v23 = vld [vmem:[%s3212_s7 + $0xd8] sm:$0xff] }
 0x101   : > { %856 = vmatpush1.msra.mxu0 %v841_v24 }
 0x102   : > { %v666_v32 = vpop.f32.mrb[6].mxu1  ;;  %785 = vmatprep.mubr.f32.mxu1 %v676_v30 }
 0x103   : > { %v677_v33 = vmul.f32 %v666_v32, %v559_v27  ;;  %v668_v34 = vpop.f32.mrb[7].mxu1  ;;  %786 = vmatmul.mubr.f32.gmra.mrb[12].mxu1 %v675_v25  ;;  %v968_v25 = vld [vmem:[%s3212_s7 + $0x80] sm:$0xff] }
 0x104   : > { %v678_v35 = vmul.f32 %v668_v34, %v560_v31  ;;  %v2040_v30 = vpack.c.bf16 %v969_v26, %v968_v25  ;;  %v962_v25 = vld [vmem:[%s3212_s7 + $0x50] sm:$0xff]  ;;  %v963_v26 = vld [vmem:[%s3212_s7 + $0x58] sm:$0xff] }
 0x106   : > { %790 = vmatprep.mubr.f32.mxu1 %v678_v35  ;;  %2041 = vmatprep.subr.bf16.mxu0 %v2040_v30  ;;  %v952_v35 = vld [vmem:[%s3212_s7] sm:$0xff] }
 0x107   : > { %791 = vmatmul.mubr.f32.gmra.mrb[14].mxu1 %v677_v33  ;;  %v980_v30 = vld [vmem:[%s3212_s7 + $0xe0] sm:$0xff] }
 0x1ce   : > { %v1886_v37 = vpop.f32.mrb[8].mxu1 }
 0x1cf   : > { %v1887_v38 = vpop.f32.mrb[9].mxu1 }
 0x1d0   : > { %v1888_v39 = vadd.f32 %v1887_v38, %v1886_v37  ;;  %v953_v37 = vld [vmem:[%s3212_s7 + $0x8] sm:$0xff]  ;;  %v970_v38 = vld [vmem:[%s3212_s7 + $0x90] sm:$0xff] }
 0x1d2   : > { %v1889_v40 = vpop.f32.mrb[10].mxu1  ;;  %v797_v41 = vsel %vm796_vm1, %v1888_v39, -inf }
 0x1d3   : > { %v1890_v42 = vpop.f32.mrb[11].mxu1  ;;  %798 = vmax.xlane.f32.xlu0 %v797_v41  ;;  %v2042_v41 = vpack.c.bf16 %v953_v37, %v952_v35  ;;  %v964_v35 = vld [vmem:[%s3212_s7 + $0x60] sm:$0xff]  ;;  %v965_v37 = vld [vmem:[%s3212_s7 + $0x68] sm:$0xff] }
 0x1d4   : > { %v1891_v44 = vadd.f32 %v1890_v42, %v1889_v40 }
 0x1d6   : > { %v1892_v45 = vpop.f32.mrb[12].mxu1  ;;  %v800_v46 = vsel %vm796_vm1, %v1891_v44, -inf }
 0x1d7   : > { %v1893_v47 = vpop.f32.mrb[13].mxu1  ;;  %801 = vmax.xlane.f32.xlu0 %v800_v46  ;;  %v954_v46 = vld [vmem:[%s3212_s7 + $0x10] sm:$0xff] }
 0x1d8   : > { %v1894_v48 = vadd.f32 %v1893_v47, %v1892_v45  ;;  %v955_v47 = vld [vmem:[%s3212_s7 + $0x18] sm:$0xff] }
 0x1da   : > { %v1895_v49 = vpop.f32.mrb[14].mxu1  ;;  %v803_v50 = vsel %vm796_vm1, %v1894_v48, -inf }
 0x1db   : > { %804 = vmax.xlane.f32.xlu1 %v803_v50  ;;  %v1896_v51 = vpop.f32.mrb[15].mxu1 }
 0x1dc   : > { %v1897_v52 = vadd.f32 %v1896_v51, %v1895_v49  ;;  %v973_v49 = vld [vmem:[%s3212_s7 + $0xa8] sm:$0xff]  ;;  %v2046_v51 = vpack.c.bf16 %v955_v47, %v954_v46  ;;  %v1828_v46 = vld [vmem:[%s2801_s23] sm:$0xff]  }
 0x1dd   : > { %v1829_v47 = vunpack.c.l.bf16 %v1828_v46 }
 0x1de   : > { %v806_v53 = vsel %vm796_vm1, %v1897_v52, -inf }
 0x1df   : > { %807 = vmax.xlane.f32.xlu1 %v806_v53 }
 0x260   : > { %v799_v54 = vpop.xlane.xlu0 %798 }
 0x261   : > { %v809_v55 = vsub.f32 %v1888_v39, %v799_v54  ;;  %v971_v39 = vld [vmem:[%s3212_s7 + $0x98] sm:$0xff]  ;;  %v956_v54 = vld [vmem:[%s3212_s7 + $0x20] sm:$0xff] }
 0x262   : > { %v2044_v45 = vpack.c.bf16 %v971_v39, %v970_v38  ;;  %v2066_v38 = vpack.c.bf16 %v965_v37, %v964_v35  ;;  %v982_v39 = vld [vmem:[%s3212_s7 + $0xf0] sm:$0xff] }
 0x263   : > { %v813_v56 = vmul.f32 1.442695, %v809_v55  ;;  %v957_v55 = vld [vmem:[%s3212_s7 + $0x28] sm:$0xff]  ;;  %v1145_v37 = vld [vmem:[%s3213_s8 + $0x70] sm:$0xff] }
 0x264   : > { %v802_v57 = vpop.xlane.xlu0 %801 }
 0x265   : > { %2215 = vpow2.f32 %v813_v56  ;;  %v810_v58 = vsub.f32 %v1891_v44, %v802_v57  ;;  %v974_v56 = vld [vmem:[%s3212_s7 + $0xb0] sm:$0xff]  ;;  %v975_v57 = vld [vmem:[%s3212_s7 + $0xb8] sm:$0xff] }
 0x267   : > { %v815_v59 = vmul.f32 1.442695, %v810_v58 }
 0x268   : > { %v805_v60 = vpop.xlane.xlu1 %804 }
 0x269   : > { %2217 = vpow2.f32 %v815_v59  ;;  %v811_v61 = vsub.f32 %v1894_v48, %v805_v60  ;;  %v972_v48 = vld [vmem:[%s3212_s7 + $0xa0] sm:$0xff]  ;;  %v2050_v59 = vpack.c.bf16 %v957_v55, %v956_v54 }
 0x26a   : > { %v2048_v53 = vpack.c.bf16 %v973_v49, %v972_v48  ;;  %v1830_v48 = vunpack.c.h.bf16 %v1828_v46 }
 0x26b   : > { %v817_v62 = vmul.f32 1.442695, %v811_v61  ;;  %v2052_v61 = vpack.c.bf16 %v975_v57, %v974_v56 }
 0x26c   : > { %v808_v63 = vpop.xlane.xlu1 %807  ;;  %v2184_v49 = vpack.i.bf16 %v1830_v48, %v1829_v47 }
 0x26d   : > { %2219 = vpow2.f32 %v817_v62  ;;  %v812_v0 = vsub.f32 %v1897_v52, %v808_v63  ;;  %v958_v62 = vld [vmem:[%s3212_s7 + $0x30] sm:$0xff]  ;;  %v959_v63 = vld [vmem:[%s3212_s7 + $0x38] sm:$0xff] }
 0x26f   : > { %v2216_v1 = vpop.eup %2215  ;;  %v819_v2 = vmul.f32 1.442695, %v812_v0  ;;  %v976_v0 = vld [vmem:[%s3212_s7 + $0xc0] sm:$0xff] }
 0x270   : > { %v821_v8 = vsel %vm796_vm1, %v2216_v1, 0.0 }
 0x271   : > { %2221 = vpow2.f32 %v819_v2  ;;  %822 = vadd.xlane.f32.xlu0 %v821_v8  ;;  %v2054_v8 = vpack.c.bf16 %v959_v63, %v958_v62  ;;  %v1131_v62 = vld [vmem:[%s3213_s8] sm:$0xff]  ;;  %v1132_v63 = vld [vmem:[%s3213_s8 + $0x8] sm:$0xff] }
 0x273   : > { %v2218_v9 = vpop.eup %2217 }
 0x274   : > { %v824_v10 = vsel %vm796_vm1, %v2218_v9, 0.0 }
 0x275   : > { %825 = vadd.xlane.f32.xlu1 %v824_v10 }
 0x277   : > { %v2220_v13 = vpop.eup %2219 }
 0x278   : > { %v827_v15 = vsel %vm796_vm1, %v2220_v13, 0.0 }
 0x279   : > { %828 = vadd.xlane.f32.xlu0 %v827_v15  ;;  %v961_v15 = vld [vmem:[%s3212_s7 + $0x48] sm:$0xff] }
 0x27b   : > { %v2222_v16 = vpop.eup %2221 }
 0x27c   : > { %v830_v18 = vsel %vm796_vm1, %v2222_v16, 0.0 }
 0x27d   : > { %831 = vadd.xlane.f32.xlu1 %v830_v18  ;;  %v978_v18 = vld [vmem:[%s3212_s7 + $0xd0] sm:$0xff] }
 0x27e   : > { %v2060_v24 = vpack.c.bf16 %v979_v23, %v978_v18  ;;  %v1138_v18 = vld [vmem:[%s3213_s8 + $0x38] sm:$0xff] }
 0x28f   : > { %2185 = vrot.lane.b32.xlu0 %v2184_v49, %s3224_s17 }
 0x2fe   : > { %v823_v32 = vpop.xlane.xlu0 %822 }
 0x2ff   : > { %2223 = vrcp.f32 %v823_v32  ;;  %v981_v32 = vld [vmem:[%s3212_s7 + $0xe8] sm:$0xff] }
 0x302   : > { %v826_v33 = vpop.xlane.xlu1 %825 }
 0x303   : > { %2225 = vrcp.f32 %v826_v33  ;;  %v2062_v33 = vpack.c.bf16 %v963_v26, %v962_v25  ;;  %v1141_v26 = vld [vmem:[%s3213_s8 + $0x50] sm:$0xff] }
 0x306   : > { %v829_v34 = vpop.xlane.xlu0 %828 }
 0x307   : > { %2227 = vrcp.f32 %v829_v34  ;;  %v2064_v34 = vpack.c.bf16 %v981_v32, %v980_v30  ;;  %v1142_v30 = vld [vmem:[%s3213_s8 + $0x58] sm:$0xff] }
 0x308   : > { %v2092_v32 = vpack.c.bf16 %v1142_v30, %v1141_v26 }
 0x309   : > { %v2224_v40 = vpop.eup %2223 }
 0x30a   : > { %v832_v42 = vpop.xlane.xlu1 %831  ;;  %v837_v44 = vmul.f32 %v2224_v40, %v2216_v1  ;;  %v977_v1 = vld [vmem:[%s3212_s7 + $0xc8] sm:$0xff]  ;;  %v983_v40 = vld [vmem:[%s3212_s7 + $0xf8] sm:$0xff] }
 0x30b   : > { %2229 = vrcp.f32 %v832_v42  ;;  %v2056_v10 = vpack.c.bf16 %v977_v1, %v976_v0  ;;  %v966_v42 = vld [vmem:[%s3212_s7 + $0x70] sm:$0xff]  ;;  %v2072_v1 = vpack.c.bf16 %v1132_v63, %v1131_v62 }
 0x30c   : > { %1807 = vmatmul.mubr.msk.f32.vlgmr.msra.gmra.mrb[0].mxu0 %vm796_vm1, %v837_v44  ;;  %v967_v44 = vld [vmem:[%s3212_s7 + $0x78] sm:$0xff]  ;;  %v1133_v0 = vld [vmem:[%s3213_s8 + $0x10] sm:$0xff] }
 0x30d   : > { %v2226_v50 = vpop.eup %2225  ;;  %925 = vmatprep.mubr.f32.mxu0 %v2359_v7  ;;  %2043 = vmatpush3.bf16.msra.mxu0 %v2042_v41  ;;  %v2068_v41 = vpack.c.bf16 %v983_v40, %v982_v39 }
 0x30e   : > { %v838_v52 = vmul.f32 %v2226_v50, %v2218_v9  ;;  %2045 = vmatprep.subr.bf16.mxu0 %v2044_v45  ;;  %v2070_v45 = vpack.c.bf16 %v967_v44, %v966_v42  ;;  %2073 = vmatprep.subr.bf16.mxu1 %v2072_v1  ;;  %v1852_v42 = vld [vmem:[%s2826_s14 + $0x8] sm:$0xff]  }
 0x30f   : > { %2075 = vmatpush3.bf16.msra.mxu1 %v2072_v1  ;;  %v1841_v46 = vunpack.c.l.bf16 %v1852_v42  ;;  %v1842_v47 = vunpack.c.h.bf16 %v1852_v42 }
 0x310   : > { %1808 = vmatmul.mubr.msk.f32.gmra.mrb[2].mxu0 %vm796_vm1, %v838_v52 }
 0x311   : > { %v2228_v58 = vpop.eup %2227  ;;  %931 = vmatprep.mubr.f32.mxu0 %v2359_v7  ;;  %2047 = vmatpush3.bf16.msra.mxu0 %v2046_v51 }
 0x312   : > { %v839_v60 = vmul.f32 %v2228_v58, %v2220_v13  ;;  %2049 = vmatprep.subr.bf16.mxu0 %v2048_v53  ;;  %v960_v13 = vld [vmem:[%s3212_s7 + $0x40] sm:$0xff] }
 0x314   : > { %1809 = vmatmul.mubr.msk.f32.gmra.mrb[4].mxu0 %vm796_vm1, %v839_v60 }
 0x315   : > { %v2230_v2 = vpop.eup %2229  ;;  %937 = vmatprep.mubr.f32.mxu0 %v2359_v7  ;;  %2051 = vmatpush3.bf16.msra.mxu0 %v2050_v59 }
 0x316   : > { %v840_v9 = vmul.f32 %v2230_v2, %v2222_v16  ;;  %2053 = vmatprep.subr.bf16.mxu0 %v2052_v61  ;;  %v2058_v16 = vpack.c.bf16 %v961_v15, %v960_v13  ;;  %v1134_v2 = vld [vmem:[%s3213_s8 + $0x18] sm:$0xff]  ;;  %v1137_v15 = vld [vmem:[%s3213_s8 + $0x30] sm:$0xff] }
 0x317   : > { %v2084_v23 = vpack.c.bf16 %v1138_v18, %v1137_v15 }
 0x318   : > { %1810 = vmatmul.mubr.msk.f32.gmra.mrb[6].mxu0 %vm796_vm1, %v840_v9  ;;  %v1135_v9 = vld [vmem:[%s3213_s8 + $0x20] sm:$0xff] }
 0x319   : > { %2055 = vmatpush3.bf16.msra.mxu0 %v2054_v8  ;;  %v2076_v8 = vpack.c.bf16 %v1134_v2, %v1133_v0 }
 0x31a   : > { %2057 = vmatprep.subr.bf16.mxu0 %v2056_v10  ;;  %v1136_v10 = vld [vmem:[%s3213_s8 + $0x28] sm:$0xff] }
 0x31b   : > { %2077 = vmatprep.subr.bf16.mxu1 %v2076_v8  ;;  %v2080_v13 = vpack.c.bf16 %v1136_v10, %v1135_v9 }
 0x31c   : > { %2079 = vmatpush3.bf16.msra.mxu1 %v2076_v8 }
 0x31d   : > { %2059 = vmatpush3.bf16.msra.mxu0 %v2058_v16  ;;  %2081 = vmatprep.subr.bf16.mxu1 %v2080_v13  ;;  %v1139_v16 = vld [vmem:[%s3213_s8 + $0x40] sm:$0xff] }
 0x31e   : > { %2061 = vmatprep.subr.bf16.mxu0 %v2060_v24  ;;  %v1140_v24 = vld [vmem:[%s3213_s8 + $0x48] sm:$0xff] }
 0x31f   : > { %v2088_v25 = vpack.c.bf16 %v1140_v24, %v1139_v16 }
 0x320   : > { %2083 = vmatpush3.bf16.msra.mxu1 %v2080_v13 }
 0x321   : > { %2063 = vmatpush3.bf16.msra.mxu0 %v2062_v33  ;;  %2085 = vmatprep.subr.bf16.mxu1 %v2084_v23  ;;  %v1143_v33 = vld [vmem:[%s3213_s8 + $0x60] sm:$0xff] }
 0x322   : > { %2065 = vmatprep.subr.bf16.mxu0 %v2064_v34  ;;  %v1144_v34 = vld [vmem:[%s3213_s8 + $0x68] sm:$0xff] }
 0x323   : > { %v2096_v35 = vpack.c.bf16 %v1144_v34, %v1143_v33 }
 0x324   : > { %2087 = vmatpush3.bf16.msra.mxu1 %v2084_v23 }
 0x325   : > { %2067 = vmatpush3.bf16.msra.mxu0 %v2066_v38  ;;  %2089 = vmatprep.subr.bf16.mxu1 %v2088_v25  ;;  %v1146_v38 = vld [vmem:[%s3213_s8 + $0x78] sm:$0xff] }
 0x326   : > { %2069 = vmatprep.subr.bf16.mxu0 %v2068_v41  ;;  %v2100_v39 = vpack.c.bf16 %v1146_v38, %v1145_v37 }
 0x328   : > { %2091 = vmatpush3.bf16.msra.mxu1 %v2088_v25 }
 0x329   : > { %2071 = vmatpush3.bf16.msra.mxu0 %v2070_v45  ;;  %2093 = vmatprep.subr.bf16.mxu1 %v2092_v32 }
 0x32c   : > { %2095 = vmatpush3.bf16.msra.mxu1 %v2092_v32 }
 0x32d   : > { %2097 = vmatprep.subr.bf16.mxu1 %v2096_v35 }
 0x330   : > { %2099 = vmatpush3.bf16.msra.mxu1 %v2096_v35 }
 0x331   : > { %2101 = vmatprep.subr.bf16.mxu1 %v2100_v39 }
 0x334   : > { %2103 = vmatpush3.bf16.msra.mxu1 %v2100_v39 }
 0x3df   : > { %v921_v50 = vpop.f32.mrb[0].mxu0 }
 0x3e0   : > { %v923_v51 = vpop.f32.mrb[1].mxu0  ;;  %v944_v53 = vmul.f32 %v921_v50, %v553_v5 }
 0x3e1   : > { %v945_v52 = vmul.f32 %v923_v51, %v554_v4  ;;  %v2199_v51 = vpack.i.bf16 %v1842_v47, %v1841_v46 }
 0x3e3   : > { %v927_v54 = vpop.f32.mrb[2].mxu0  ;;  %1048 = vmatprep.mubr.f32.mxu0 %v945_v52 }
 0x3e4   : > { %v929_v55 = vpop.f32.mrb[3].mxu0  ;;  %1049 = vmatmul.mubr.f32.vlgmr.msra.gmra.mrb[8].mxu0 %v944_v53  ;;  %v946_v57 = vmul.f32 %v927_v54, %v555_v14  ;;  %v1837_v14 = vunpack.c.l.bf16 %v1836_v12 }
 0x3e5   : > { %v947_v56 = vmul.f32 %v929_v55, %v556_v11 }
 0x3e7   : > { %v933_v58 = vpop.f32.mrb[4].mxu0  ;;  %1053 = vmatprep.mubr.f32.mxu0 %v947_v56 }
 0x3e8   : > { %v935_v59 = vpop.f32.mrb[5].mxu0  ;;  %1054 = vmatmul.mubr.f32.gmra.mrb[10].mxu0 %v946_v57  ;;  %v948_v3 = vmul.f32 %v933_v58, %v557_v17  ;;  %v1838_v17 = vunpack.c.h.bf16 %v1836_v12  ;;  %v2886_v57 = vpop.permute.xlu0 %2185 }
 0x3e9   : > { %v949_v4 = vmul.f32 %v935_v59, %v558_v19  ;;  %v2187_v58 = vunpack.i.l.bf16 %v2886_v57 }
 0x3ea   : > { %v2189_v19 = vpack.i.bf16 %v1838_v17, %v1837_v14 }
 0x3eb   : > { %v939_v5 = vpop.f32.mrb[6].mxu0  ;;  %1058 = vmatprep.mubr.f32.mxu0 %v949_v4 }
 0x3ec   : > { %v941_v60 = vpop.f32.mrb[7].mxu0  ;;  %1059 = vmatmul.mubr.f32.gmra.mrb[12].mxu0 %v948_v3  ;;  %v950_v11 = vmul.f32 %v939_v5, %v559_v27  ;;  %2190 = vrot.lane.b32.xlu1 %v2189_v19, %s3226_s19  ;;  %v1117_v3 = vsel %vm569_vm0, %v1845_v21, %v2187_v58  ;;  %v2188_v5 = vunpack.i.h.bf16 %v2886_v57 }
 0x3ed   : > { %v951_v6 = vmul.f32 %v941_v60, %v560_v31  ;;  %v1851_v31 = vld [vmem:[%s2801_s23 + $0x8] sm:$0xff]   ;;  %s3010_s23 = scalar_lea.vmem %s3218_s13, %s3236_s30  ;;  %s3237_s30 = smov 64  }
 0x3ee   : > { %v1833_v22 = vunpack.c.l.bf16 %v1851_v31  ;;  %v1834_v27 = vunpack.c.h.bf16 %v1851_v31  ;;  %v1118_v21 = vsel %vm569_vm0, %v1846_v28, %v2188_v5 }
 0x3ef   : > { %1063 = vmatprep.mubr.f32.mxu0 %v951_v6 }
 0x3f0   : > { %1064 = vmatmul.mubr.f32.gmra.mrb[14].mxu0 %v950_v11  ;;  %v2194_v61 = vpack.i.bf16 %v1834_v27, %v1833_v22 }
 0x3f1   : > { %1460 = vmatprep.mubr.f32.mxu0 %v2359_v7 }
 0x3f2   : > { %2195 = vrot.lane.b32.xlu0 %v2194_v61, %s3224_s17  ;;  %s3238_s17 = smov 32  }
 0x45e   : > { %v2889_v59 = vpop.permute.xlu1 %2190 }
 0x45f   : > { %v2192_v4 = vunpack.i.l.bf16 %v2889_v59  ;;  %v2193_v6 = vunpack.i.h.bf16 %v2889_v59 }
 0x461   : > { %v1122_v60 = vsel %vm1121_vm2, %v1117_v3, %v2192_v4  ;;  %v1123_v19 = vsel %vm1121_vm2, %v1118_v21, %v2193_v6  ;;  %v1355_v3 = vld [vmem:[%s3215_s10 + $0x18] sm:$0xff]  ;;  %v1354_v21 = vld [vmem:[%s3215_s10 + $0x10] sm:$0xff] }
 0x464   : > { %v2911_v14 = vpop.permute.xlu0 %2195 }
 0x465   : > { %v2198_v31 = vunpack.i.h.bf16 %v2911_v14  ;;  %v2197_v22 = vunpack.i.l.bf16 %v2911_v14 }
 0x467   : > { %v1119_v28 = vsel %vm569_vm0, %v1849_v36, %v2197_v22  ;;  %v1120_v61 = vsel %vm569_vm0, %v1850_v43, %v2198_v31  ;;  %v1811_v43 = vld [vmem:[%s3214_s9] ss:$0 sm:$0xff] }
 0x4b7   : > { %v1930_v40 = vpop.f32.mrb[8].mxu0 }
 0x4b8   : > { %v1931_v41 = vpop.f32.mrb[9].mxu0 }
 0x4b9   : > { %v1932_v44 = vadd.f32 %v1931_v41, %v1930_v40 }
 0x4bb   : > { %v1933_v45 = vpop.f32.mrb[10].mxu0  ;;  %1105 = vrot.lane.b32.xlu1 %v1932_v44, %s2362_s20 }
 0x4bc   : > { %v1934_v48 = vpop.f32.mrb[11].mxu0 }
 0x4bd   : > { %v1935_v49 = vadd.f32 %v1934_v48, %v1933_v45 }
 0x4bf   : > { %v1936_v50 = vpop.f32.mrb[12].mxu0  ;;  %1107 = vrot.lane.b32.xlu1 %v1935_v49, %s2362_s20 }
 0x4c0   : > { %v1937_v52 = vpop.f32.mrb[13].mxu0 }
 0x4c1   : > { %v1938_v53 = vadd.f32 %v1937_v52, %v1936_v50 }
 0x4c3   : > { %v1939_v54 = vpop.f32.mrb[14].mxu0  ;;  %2200 = vrot.lane.b32.xlu1 %v2199_v51, %s3226_s19  ;;  %1109 = vrot.lane.b32.xlu0 %v1938_v53, %s2362_s20  ;;  %s3160_s19 = scalar_lea.hbm %s3217_s12, %s1826_s16 }
 0x4c4   : > { %v1940_v55 = vpop.f32.mrb[15].mxu0 }
 0x4c5   : > { %v1941_v56 = vadd.f32 %v1940_v55, %v1939_v54  ;;  %v2363_v55 = vmov 1  }
 0x4c6   : > { %2205 = vset.pattern.permute.xlu1 %v2363_v55  ;;  %2204 = vset.pattern.permute.xlu0 %v2363_v55 }
 0x4c7   : > { %1111 = vrot.lane.b32.xlu1 %v1941_v56, %s2362_s20  ;;  %v1353_v56 = vld [vmem:[%s3215_s10 + $0x8] sm:$0xff] }
 0x52d   : > { %v1106_v11 = vpop.permute.xlu1 %1105 }
 0x52e   : > { %v2903_v12 = vsel %vm1126_vm3, %v1122_v60, %v1106_v11  ;;  %v1352_v60 = vld [vmem:[%s3215_s10] sm:$0xff]  ;;  %v2104_v11 = vpack.c.bf16 %v1355_v3, %v1353_v56  ;;  %v1374_v3 = vld [vmem:[%s3215_s10 + $0xb0] sm:$0xff] }
 0x52f   : > { %1994 = vmatprep.mubr.f32.mxu1 %v2903_v12 }
 0x530   : > { %2105 = vmatprep.subr.bf16.mxu0 %v2104_v11 }
 0x531   : > { %v1108_v17 = vpop.permute.xlu1 %1107 }
 0x532   : > { %v2919_v27 = vsel %vm1126_vm3, %v1123_v19, %v1108_v17  ;;  %v1357_v17 = vld [vmem:[%s3215_s10 + $0x28] sm:$0xff]  ;;  %v1359_v19 = vld [vmem:[%s3215_s10 + $0x38] sm:$0xff] }
 0x533   : > { %1995 = vmatmul.mubr.f32.vlgmr.msra.gmra.mrb[16].mxu1 %v2919_v27 }
 0x535   : > { %v2922_v20 = vpop.permute.xlu1 %2200  ;;  %v1110_v0 = vpop.permute.xlu0 %1109 }
 0x536   : > { %v2203_v62 = vunpack.i.h.bf16 %v2922_v20  ;;  %v2202_v63 = vunpack.i.l.bf16 %v2922_v20 }
 0x538   : > { %v1124_v1 = vsel %vm1121_vm2, %v1119_v28, %v2202_v63  ;;  %v1125_v2 = vsel %vm1121_vm2, %v1120_v61, %v2203_v62  ;;  %v2106_v28 = vpack.c.bf16 %v1354_v21, %v1352_v60  ;;  %v2108_v61 = vpack.c.bf16 %v1359_v19, %v1357_v17  ;;  %v1377_v17 = vld [vmem:[%s3215_s10 + $0xc8] sm:$0xff]  ;;  %v1379_v19 = vld [vmem:[%s3215_s10 + $0xd8] sm:$0xff] }
 0x539   : > { %v1112_v36 = vpop.permute.xlu1 %1111  ;;  %v2943_v8 = vsel %vm1126_vm3, %v1124_v1, %v1110_v0  ;;  %v1356_v0 = vld [vmem:[%s3215_s10 + $0x20] sm:$0xff]  ;;  %v1358_v1 = vld [vmem:[%s3215_s10 + $0x30] sm:$0xff] }
 0x53a   : > { %1997 = vmatprep.mubr.f32.mxu1 %v2943_v8  ;;  %v2947_v29 = vsel %vm1126_vm3, %v1125_v2, %v1112_v36  ;;  %v1361_v2 = vld [vmem:[%s3215_s10 + $0x48] sm:$0xff]  ;;  %v1363_v36 = vld [vmem:[%s3215_s10 + $0x58] sm:$0xff]  ;;  %2107 = vmatpush1.bf16.msra.mxu0 %v2106_v28  ;;  %v2128_v28 = vpack.c.bf16 %v1379_v19, %v1377_v17 }
 0x53b   : > { %1998 = vmatmul.mubr.f32.gmra.mrb[18].mxu1 %v2947_v29  ;;  %2109 = vmatprep.subr.bf16.mxu0 %v2108_v61  ;;  %v1376_v61 = vld [vmem:[%s3215_s10 + $0xc0] sm:$0xff] }
 0x606   : > { %v1996_v9 = vpop.f32.mrb[16].mxu1 }
 0x607   : > { %v1226_v10 = vadd.f32 %v1996_v9, %v1811_v43  ;;  %v1220_v13 = vpop.f32.mrb[17].mxu1  ;;  %v2112_v9 = vpack.c.bf16 %v1363_v36, %v1361_v2  ;;  %v1383_v2 = vld [vmem:[%s3215_s10 + $0xf8] sm:$0xff] }
 0x608   : > { %v1221_v15 = vadd.f32 %v1811_v43, %v1220_v13 }
 0x609   : > { %v1243_v18 = vsel %vm1239_vm4, %v1226_v10, -inf }
 0x60a   : > { %1244 = vmax.xlane.f32.xlu1 %v1243_v18  ;;  %v1240_v23 = vsel %vm1239_vm4, %v1221_v15, -inf }
 0x60b   : > { %1241 = vmax.xlane.f32.xlu0 %v1240_v23  ;;  %v1360_v23 = vld [vmem:[%s3215_s10 + $0x40] sm:$0xff] }
 0x60e   : > { %v1999_v16 = vpop.f32.mrb[18].mxu1 }
 0x60f   : > { %v1230_v24 = vpop.f32.mrb[19].mxu1  ;;  %v1236_v26 = vadd.f32 %v1999_v16, %v1811_v43  ;;  %v1362_v16 = vld [vmem:[%s3215_s10 + $0x50] sm:$0xff] }
 0x610   : > { %v1231_v25 = vadd.f32 %v1811_v43, %v1230_v24  ;;  %v2110_v43 = vpack.c.bf16 %v1358_v1, %v1356_v0  ;;  %v1381_v1 = vld [vmem:[%s3215_s10 + $0xe8] sm:$0xff] }
 0x611   : > { %v1249_v32 = vsel %vm1239_vm4, %v1236_v26, -inf  ;;  %v2132_v36 = vpack.c.bf16 %v1383_v2, %v1381_v1 }
 0x612   : > { %v1246_v30 = vsel %vm1239_vm4, %v1231_v25, -inf  ;;  %2111 = vmatpush1.bf16.msra.mxu0 %v2110_v43  ;;  %v1380_v43 = vld [vmem:[%s3215_s10 + $0xe0] sm:$0xff] }
 0x613   : > { %1247 = vmax.xlane.f32.xlu0 %v1246_v30  ;;  %2113 = vmatprep.subr.bf16.mxu0 %v2112_v9  ;;  %v1382_v9 = vld [vmem:[%s3215_s10 + $0xf0] sm:$0xff] }
 0x617   : > { %1250 = vmax.xlane.f32.xlu0 %v1249_v32 }
 0x697   : > { %v1245_v33 = vpop.xlane.xlu1 %1244 }
 0x698   : > { %v1253_v34 = vsub.f32 %v1226_v10, %v1245_v33  ;;  %v1242_v35 = vpop.xlane.xlu0 %1241  ;;  %v1365_v33 = vld [vmem:[%s3215_s10 + $0x68] sm:$0xff] }
 0x699   : > { %v1252_v37 = vsub.f32 %v1221_v15, %v1242_v35  ;;  %v1364_v35 = vld [vmem:[%s3215_s10 + $0x60] sm:$0xff] }
 0x69a   : > { %v1258_v38 = vmul.f32 1.442695, %v1253_v34  ;;  %v1367_v34 = vld [vmem:[%s3215_s10 + $0x78] sm:$0xff] }
 0x69b   : > { %v1256_v39 = vmul.f32 1.442695, %v1252_v37  ;;  %v2116_v37 = vpack.c.bf16 %v1367_v34, %v1365_v33 }
 0x69c   : > { %2231 = vpow2.f32 %v1258_v38  ;;  %v1366_v38 = vld [vmem:[%s3215_s10 + $0x70] sm:$0xff] }
 0x69d   : > { %2233 = vpow2.f32 %v1256_v39  ;;  %v2118_v39 = vpack.c.bf16 %v1366_v38, %v1364_v35 }
 0x6a0   : > { %v1248_v40 = vpop.xlane.xlu0 %1247 }
 0x6a1   : > { %v1254_v41 = vsub.f32 %v1231_v25, %v1248_v40  ;;  %v2364_v40 = vmov 2  }
 0x6a3   : > { %v1260_v42 = vmul.f32 1.442695, %v1254_v41  ;;  %v1369_v41 = vld [vmem:[%s3215_s10 + $0x88] sm:$0xff] }
 0x6a4   : > { %v1251_v44 = vpop.xlane.xlu0 %1250 }
 0x6a5   : > { %2235 = vpow2.f32 %v1260_v42  ;;  %v1255_v45 = vsub.f32 %v1236_v26, %v1251_v44  ;;  %v2114_v26 = vpack.c.bf16 %v1362_v16, %v1360_v23  ;;  %v1371_v42 = vld [vmem:[%s3215_s10 + $0x98] sm:$0xff]  ;;  %v1284_v23 = vlaneseq }
 0x6a6   : > { %v2232_v46 = vpop.eup %2231  ;;  %v2120_v44 = vpack.c.bf16 %v1371_v42, %v1369_v41 }
 0x6a7   : > { %v2234_v47 = vpop.eup %2233  ;;  %v1262_v48 = vmul.f32 1.442695, %v1255_v45  ;;  %v1267_v49 = vsel %vm1239_vm4, %v2232_v46, 0.0  ;;  %2115 = vmatpush1.bf16.msra.mxu0 %v2114_v26  ;;  %v1368_v45 = vld [vmem:[%s3215_s10 + $0x80] sm:$0xff]  ;;  %v1285_v16 = vand.u32 127, %v1284_v23 }
 0x6a8   : > { %1268 = vadd.xlane.f32.xlu1 %v1267_v49  ;;  %v1264_v50 = vsel %vm1239_vm4, %v2234_v47, 0.0  ;;  %2117 = vmatprep.subr.bf16.mxu0 %v2116_v37 }
 0x6a9   : > { %2237 = vpow2.f32 %v1262_v48  ;;  %1265 = vadd.xlane.f32.xlu0 %v1264_v50  ;;  %v1373_v50 = vld [vmem:[%s3215_s10 + $0xa8] sm:$0xff]  ;;  %vm1287_vm5 = vcmp.lt.s32.totalorder %v1285_v16, 96  ;;  %vm1286_vm6 = vcmp.lt.s32.totalorder %v1285_v16, 32 }
 0x6ab   : > { %2119 = vmatpush1.bf16.msra.mxu0 %v2118_v39 }
 0x6ac   : > { %2121 = vmatprep.subr.bf16.mxu0 %v2120_v44 }
 0x6af   : > { %v2959_v51 = vpop.eup %2235 }
 0x6b0   : > { %v1270_v52 = vsel %vm1239_vm4, %v2959_v51, 0.0 }
 0x6b1   : > { %1271 = vadd.xlane.f32.xlu0 %v1270_v52  ;;  %v1375_v52 = vld [vmem:[%s3215_s10 + $0xb8] sm:$0xff] }
 0x6b2   : > { %v2124_v56 = vpack.c.bf16 %v1375_v52, %v1373_v50  ;;  %v1384_v50 = vld [vmem:[%s3216_s11] sm:$0x3] }
 0x6b3   : > { %v2963_v53 = vpop.eup %2237 }
 0x6b4   : > { %v1273_v54 = vsel %vm1239_vm4, %v2963_v53, 0.0 }
 0x6b5   : > { %1274 = vadd.xlane.f32.xlu1 %v1273_v54  ;;  %v2365_v54 = vmov 0  }
 0x735   : > { %v1269_v10 = vpop.xlane.xlu1 %1268 }
 0x736   : > { %2239 = vrcp.f32 %v1269_v10  ;;  %v1266_v13 = vpop.xlane.xlu0 %1265  ;;  %v2134_v10 = vpack.c.bf16 %v1382_v9, %v1380_v43 }
 0x737   : > { %2241 = vrcp.f32 %v1266_v13 }
 0x73e   : > { %v1272_v15 = vpop.xlane.xlu0 %1271 }
 0x73f   : > { %2243 = vrcp.f32 %v1272_v15 }
 0x740   : > { %v2240_v18 = vpop.eup %2239 }
 0x741   : > { %v2242_v24 = vpop.eup %2241  ;;  %v1281_v25 = vmul.f32 %v2240_v18, %v2232_v46  ;;  %v1370_v46 = vld [vmem:[%s3215_s10 + $0x90] sm:$0xff] }
 0x742   : > { %v1275_v30 = vpop.xlane.xlu1 %1274  ;;  %v3012_v32 = vmul.f32 %v2242_v24, %v2234_v47  ;;  %v2122_v48 = vpack.c.bf16 %v1370_v46, %v1368_v45 }
 0x743   : > { %2245 = vrcp.f32 %v1275_v30  ;;  %1295 = vperm.xlu1 %2205, %v1281_v25   ;;  %1638 = vst.msk [vmem:[%s3010_s23 + $0x8] sm:$0xff] %vm1239_vm4, %v1281_v25 }
 0x744   : > { %1290 = vperm.xlu0 %2204, %v3012_v32   ;;  %1637 = vst.msk [vmem:[%s3010_s23] sm:$0xff] %vm1239_vm4, %v3012_v32  ;;  %2123 = vmatpush1.bf16.msra.mxu0 %v2122_v48  ;;  %v1387_v48 = vshrl.u32 %v1284_v23, 7 }
 0x745   : > { %2125 = vmatprep.subr.bf16.mxu0 %v2124_v56 }
 0x747   : > { %2206 = vset.pattern.permute.xlu1 %v2364_v40 }
 0x748   : > { %1313 = vperm.xlu1 %2206, %v1281_v25  }
 0x749   : > { %v2244_v47 = vpop.eup %2243 }
 0x74a   : > { %v1282_v49 = vmul.f32 %v2244_v47, %v2959_v51  ;;  %v1372_v51 = vld [vmem:[%s3215_s10 + $0xa0] sm:$0xff] }
 0x74b   : > { %v2126_v11 = vpack.c.bf16 %v1374_v3, %v1372_v51 }
 0x74c   : > { %2207 = vset.pattern.permute.xlu1 %v2365_v54  ;;  %1639 = vst.msk [vmem:[%s3010_s23 + $0x10] sm:$0xff] %vm1239_vm4, %v1282_v49 }
 0x74d   : > { %v2246_v60 = vpop.eup %2245  ;;  %1333 = vperm.xlu1 %2207, %v1281_v25   ;;  %2127 = vmatpush1.bf16.msra.mxu0 %v2126_v11 }
 0x74e   : > { %v1283_v21 = vmul.f32 %v2246_v60, %v2963_v53  ;;  %v1378_v53 = vld [vmem:[%s3215_s10 + $0xd0] sm:$0xff]  ;;  %2129 = vmatprep.subr.bf16.mxu0 %v2128_v28 }
 0x74f   : > { %v2130_v0 = vpack.c.bf16 %v1378_v53, %v1376_v61 }
 0x750   : > { %1305 = vperm.xlu0 %2204, %v1283_v21   ;;  %1640 = vst.msk [vmem:[%s3010_s23 + $0x18] sm:$0xff] %vm1239_vm4, %v1283_v21 }
 0x751   : > { %2208 = vset.pattern.permute.xlu1 %v2364_v40  ;;  %2131 = vmatpush1.bf16.msra.mxu0 %v2130_v0 }
 0x752   : > { %1309 = vperm.xlu1 %2208, %v3012_v32   ;;  %2133 = vmatprep.subr.bf16.mxu0 %v2132_v36 }
 0x754   : > { %2214 = vset.pattern.permute.xlu0 %v2365_v54 }
 0x755   : > { %1341 = vperm.xlu0 %2214, %v1283_v21   ;;  %2135 = vmatpush1.bf16.msra.mxu0 %v2134_v10 }
 0x756   : > { %2209 = vset.pattern.permute.xlu1 %v2365_v54 }
 0x757   : > { %1329 = vperm.xlu1 %2209, %v3012_v32  }
 0x75b   : > { %2210 = vset.pattern.permute.xlu1 %v2363_v55 }
 0x75c   : > { %1300 = vperm.xlu1 %2210, %v1282_v49  }
 0x760   : > { %2211 = vset.pattern.permute.xlu1 %v2364_v40 }
 0x761   : > { %1317 = vperm.xlu1 %2211, %v1282_v49  }
 0x765   : > { %2212 = vset.pattern.permute.xlu1 %v2365_v54 }
 0x766   : > { %1337 = vperm.xlu1 %2212, %v1282_v49   ;;  %v1388_v49 = vsub.s32 0, %v1387_v48 }
 0x768   : > { %v1389_v52 = vrot.slane %v1384_v50, %v1388_v49 }
 0x76a   : > { %2213 = vset.pattern.permute.xlu1 %v2364_v40 }
 0x76b   : > { %1321 = vperm.xlu1 %2213, %v1283_v21  }
 0x7c2   : > { %v1296_v13 = vpop.permute.xlu1 %1295 }
 0x7c3   : > { %v1291_v25 = vpop.permute.xlu0 %1290 }
 0x7c7   : > { %v1314_v15 = vpop.permute.xlu1 %1313 }
 0x7c8   : > { %v1325_v32 = vsel %vm1287_vm5, %v1296_v13, %v1314_v15 }
 0x7cc   : > { %v1334_v18 = vpop.permute.xlu1 %1333 }
 0x7cd   : > { %v1345_v34 = vsel %vm1286_vm6, %v1334_v18, %v1325_v32 }
 0x7ce   : > { %v1349_v37 = vmul.f32 %v1345_v34, %v2919_v27 }
 0x7cf   : > { %v1306_v39 = vpop.permute.xlu0 %1305 }
 0x7d1   : > { %v1310_v24 = vpop.permute.xlu1 %1309 }
 0x7d2   : > { %v1324_v26 = vsel %vm1287_vm5, %v1291_v25, %v1310_v24 }
 0x7d4   : > { %v1342_v45 = vpop.permute.xlu0 %1341 }
 0x7d6   : > { %v1330_v30 = vpop.permute.xlu1 %1329 }
 0x7d7   : > { %v1344_v55 = vsel %vm1286_vm6, %v1330_v30, %v1324_v26 }
 0x7d8   : > { %v1348_v33 = vmul.f32 %v1344_v55, %v2903_v12 }
 0x7da   : > { %1461 = vmatmul.mubr.f32.vlgmr.msra.gmra.mrb[16].mxu0 %v1348_v33 }
 0x7db   : > { %v1301_v35 = vpop.permute.xlu1 %1300  ;;  %1466 = vmatprep.mubr.f32.mxu0 %v2359_v7 }
 0x7de   : > { %1467 = vmatmul.mubr.f32.gmra.mrb[18].mxu0 %v1349_v37 }
 0x7df   : > { %1472 = vmatprep.mubr.f32.mxu0 %v2359_v7 }
 0x7e0   : > { %v1318_v38 = vpop.permute.xlu1 %1317 }
 0x7e1   : > { %v1326_v40 = vsel %vm1287_vm5, %v1301_v35, %v1318_v38 }
 0x7e5   : > { %v1338_v41 = vpop.permute.xlu1 %1337 }
 0x7e6   : > { %v1346_v42 = vsel %vm1286_vm6, %v1338_v41, %v1326_v40 }
 0x7e7   : > { %v1350_v12 = vmul.f32 %v1346_v42, %v2943_v8 }
 0x7e9   : > { %1473 = vmatmul.mubr.f32.gmra.mrb[20].mxu0 %v1350_v12 }
 0x7ea   : > { %v1322_v44 = vpop.permute.xlu1 %1321  ;;  %1478 = vmatprep.mubr.f32.mxu0 %v2359_v7 }
 0x7eb   : > { %v1327_v46 = vsel %vm1287_vm5, %v1306_v39, %v1322_v44 }
 0x7ec   : > { %v1347_v27 = vsel %vm1286_vm6, %v1342_v45, %v1327_v46 }
 0x7ed   : > { %v1351_v47 = vmul.f32 %v1347_v27, %v2947_v29 }
 0x7ef   : > { %1479 = vmatmul.mubr.f32.gmra.mrb[22].mxu0 %v1351_v47 }
 0x8ad   : > { %v1462_v8 = vpop.f32.mrb[16].mxu0 }
 0x8ae   : > { %v1463_v54 = vadd.f32 %v1462_v8, %v1389_v52  ;;  %v1464_v56 = vpop.f32.mrb[17].mxu0 }
 0x8b0   : > { %v1812_v51 = vmul.f32 -1.442695, %v1463_v54 }
 0x8b1   : > { %v1468_v7 = vpop.f32.mrb[18].mxu0 }
 0x8b2   : > { %2247 = vpow2.f32 %v1812_v51  ;;  %v1469_v3 = vadd.f32 %v1468_v7, %v1389_v52  ;;  %v1470_v60 = vpop.f32.mrb[19].mxu0 }
 0x8b4   : > { %v1813_v11 = vmul.f32 -1.442695, %v1469_v3 }
 0x8b6   : > { %2249 = vpow2.f32 %v1813_v11 }
 0x8bc   : > { %v2248_v21 = vpop.eup %2247  ;;  %v1474_v29 = vpop.f32.mrb[20].mxu0 }
 0x8bd   : > { %v1501_v17 = vadd.f32 1.0, %v2248_v21  ;;  %v3107_v19 = vadd.f32 %v1474_v29, %v1389_v52  ;;  %v1476_v28 = vpop.f32.mrb[21].mxu0 }
 0x8bf   : > { %2251 = vrcp.f32 %v1501_v17  ;;  %v1814_v61 = vmul.f32 -1.442695, %v3107_v19 }
 0x8c0   : > { %v2250_v53 = vpop.eup %2249 }
 0x8c1   : > { %v1502_v0 = vadd.f32 1.0, %v2250_v53  ;;  %2253 = vpow2.f32 %v1814_v61 }
 0x8c2   : > { %v1480_v1 = vpop.f32.mrb[22].mxu0 }
 0x8c3   : > { %2255 = vrcp.f32 %v1502_v0  ;;  %v3110_v2 = vadd.f32 %v1480_v1, %v1389_v52  ;;  %v1482_v36 = vpop.f32.mrb[23].mxu0 }
 0x8c5   : > { %v1815_v43 = vmul.f32 -1.442695, %v3110_v2 }
 0x8c7   : > { %2257 = vpow2.f32 %v1815_v43 }
 0x8c9   : > { %v2252_v9 = vpop.eup %2251 }
 0x8ca   : > { %1517 = vrot.lane.b32.xlu1 %v2252_v9, %s2362_s20  ;;  %v1533_v10 = vmul.f32 %v2252_v9, %v2187_v58  ;;  %v1557_v23 = vmul.f32 %v2252_v9, %v2192_v4 }
 0x8cb   : > { %v2254_v13 = vpop.eup %2253 }
 0x8cc   : > { %1541 = vrot.lane.b32.xlu0 %v1533_v10, %s3237_s30  ;;  %v1503_v18 = vadd.f32 1.0, %v2254_v13 }
 0x8cd   : > { %v2256_v15 = vpop.eup %2255 }
 0x8ce   : > { %1519 = vrot.lane.b32.xlu1 %v2256_v15, %s2362_s20  ;;  %2259 = vrcp.f32 %v1503_v18  ;;  %v1534_v16 = vmul.f32 %v2256_v15, %v2188_v5  ;;  %v1558_v58 = vmul.f32 %v2256_v15, %v2193_v6  ;;  %v1392_v6 = vsub.s32 1, %v1387_v48 }
 0x8d0   : > { %1565 = vrot.lane.b32.xlu0 %v1557_v23, %s3238_s17 }
 0x8d1   : > { %v2258_v24 = vpop.eup %2257 }
 0x8d2   : > { %v1504_v25 = vadd.f32 1.0, %v2258_v24  ;;  %1543 = vrot.lane.b32.xlu1 %v1534_v16, %s3237_s30 }
 0x8d4   : > { %2261 = vrcp.f32 %v1504_v25 }
 0x8d5   : > { %2263 = vtanh.f32 %v1463_v54 }
 0x8d6   : > { %1567 = vrot.lane.b32.xlu1 %v1558_v58, %s3238_s17 }
 0x8d8   : > { %v2260_v26 = vpop.eup %2259 }
 0x8d9   : > { %1521 = vrot.lane.b32.xlu0 %v2260_v26, %s2362_s20  ;;  %v1535_v4 = vmul.f32 %v2260_v26, %v2197_v22  ;;  %v1559_v57 = vmul.f32 %v2260_v26, %v2202_v63  ;;  %v1393_v22 = vrot.slane %v1384_v50, %v1392_v6 }
 0x8db   : > { %v1465_v55 = vadd.f32 %v1464_v56, %v1393_v22  ;;  %v1471_v33 = vadd.f32 %v1470_v60, %v1393_v22  ;;  %v1477_v34 = vadd.f32 %v1476_v28, %v1393_v22  ;;  %v1483_v42 = vadd.f32 %v1482_v36, %v1393_v22 }
 0x8dd   : > { %1545 = vrot.lane.b32.xlu0 %v1535_v4, %s3237_s30  ;;  %v1816_v32 = vmul.f32 -1.442695, %v1465_v55  ;;  %v1817_v63 = vmul.f32 -1.442695, %v1471_v33  ;;  %v1819_v48 = vmul.f32 -1.442695, %v1483_v42 }
 0x8de   : > { %v2262_v30 = vpop.eup %2261 }
 0x8df   : > { %1523 = vrot.lane.b32.xlu1 %v2262_v30, %s2362_s20  ;;  %v1536_v59 = vmul.f32 %v2262_v30, %v2198_v31  ;;  %v1560_v5 = vmul.f32 %v2262_v30, %v2203_v62  ;;  %2265 = vpow2.f32 %v1816_v32  ;;  %v2264_v14 = vpop.eup %2263  ;;  %v1818_v62 = vmul.f32 -1.442695, %v1477_v34  ;;  %s483_s20 = sand.u32 1, %s2349_s26  }
 0x8e0   : > { %2267 = vpow2.f32 %v1817_v63  ;;  %s1791_s4 = sshll.u32 %s483_s20, 5  ;;  %s3164_s21 = scalar_lea.sflag [#allocation3], %s483_s20 }
 0x8e1   : > { %1569 = vrot.lane.b32.xlu0 %v1559_v57, %s3238_s17  ;;  %2269 = vtanh.f32 %v1469_v3  ;;  %s485_s27 = scalar_lea.vmem [#allocation2], %s1791_s4 }
 0x8e2   : > { %s1660_s23 = sshll.u32 %s485_s27, 4  ;;  %s3155_s23 = int_to_ptr.vmem [resolvable:$true] %s1660_s23 }
 0x8e3   : > { %1547 = vrot.lane.b32.xlu1 %v1536_v59, %s3237_s30  ;;  %s2295_s22 = scalar_lea.vmem %s3155_s23, 512  ;;  %s2301_s30 = scalar_lea.vmem %s2300_s24, 1024 }
 0x8e4   : > { %p2296_p11 = scmp.ne.s32.totalorder %s3155_s23, %s2295_s22  ;;  %p2302_p0 = scmp.lt.s32.totalorder %s3155_s23, %s2300_s24 }
 0x8e5   : > { %p2303_p1 = scmp.lt.s32.totalorder %s2301_s30, %s2295_s22 }
 0x8e6   : > { %p2297_p12 = pnand %p2296_p11, %p2477_p5 }
 0x8e7   : > { %1571 = vrot.lane.b32.xlu1 %v1560_v5, %s3238_s17  ;;  %p2304_p2 = por %p2303_p1, %p2302_p0 }
 0x8e8   : > { %p2298_p13 = pneg %p2297_p12 }
 0x8e9   : > { %v2266_v31 = vpop.eup %2265 }
 0x8ea   : > { %v1593_v20 = vadd.f32 1.0, %v2266_v31  ;;  %v2268_v40 = vpop.eup %2267  ;;  %p2305_p3 = pnand %p2304_p2, %p2298_p13 }
 0x8eb   : > { %v2270_v45 = vpop.eup %2269  ;;  %v1594_v46 = vadd.f32 1.0, %v2268_v40 }
 0x8ec   : > { %2271 = vrcp.f32 %v1593_v20 }
 0x8ed   : > { %2273 = vpow2.f32 %v1818_v62 }
 0x8f6   : > { %v2272_v54 = vpop.eup %2271 }
 0x8f7   : > { %v2274_v56 = vpop.eup %2273 }
 0x8f8   : > { %v1595_v17 = vadd.f32 1.0, %v2274_v56 }
 0x93c   : > { %v1518_v35 = vpop.permute.xlu1 %1517 }
 0x93d   : > { %v1529_v37 = vmul.f32 %v2264_v14, %v1518_v35 }
 0x93e   : > { %v1542_v38 = vpop.permute.xlu0 %1541 }
 0x93f   : > { %v1553_v41 = vadd.f32 %v1542_v38, %v1529_v37 }
 0x940   : > { %v1520_v39 = vpop.permute.xlu1 %1519 }
 0x941   : > { %v1530_v47 = vmul.f32 %v2270_v45, %v1520_v39 }
 0x942   : > { %v1566_v12 = vpop.permute.xlu0 %1565 }
 0x943   : > { %v1577_v44 = vadd.f32 %v1566_v12, %v1553_v41 }
 0x944   : > { %v1544_v27 = vpop.permute.xlu1 %1543 }
 0x945   : > { %2275 = vtanh.f32 %v1577_v44  ;;  %1617 = vrot.lane.b32.xlu0 %v1577_v44, %s3238_s17  ;;  %v1554_v49 = vadd.f32 %v1544_v27, %v1530_v47 }
 0x946   : > { %2277 = vtanh.f32 %v3107_v19 }
 0x947   : > { %2279 = vrcp.f32 %v1594_v46 }
 0x948   : > { %v1568_v50 = vpop.permute.xlu1 %1567  ;;  %2281 = vtanh.f32 %v3110_v2 }
 0x949   : > { %v1578_v52 = vadd.f32 %v1568_v50, %v1554_v49  ;;  %2283 = vpow2.f32 %v1819_v48 }
 0x94b   : > { %2285 = vtanh.f32 %v1578_v52  ;;  %1619 = vrot.lane.b32.xlu1 %v1578_v52, %s3238_s17  ;;  %v1522_v8 = vpop.permute.xlu0 %1521 }
 0x94c   : > { %2287 = vrcp.f32 %v1595_v17 }
 0x94f   : > { %v2276_v51 = vpop.eup %2275  ;;  %v1546_v3 = vpop.permute.xlu0 %1545 }
 0x950   : > { %v2278_v7 = vpop.eup %2277  ;;  %v1609_v60 = vmul.f32 %v2276_v51, %v2272_v54 }
 0x951   : > { %v1531_v11 = vmul.f32 %v2278_v7, %v1522_v8  ;;  %v1524_v21 = vpop.permute.xlu1 %1523  ;;  %v2280_v29 = vpop.eup %2279 }
 0x952   : > { %v2282_v19 = vpop.eup %2281 }
 0x953   : > { %v1555_v28 = vadd.f32 %v1546_v3, %v1531_v11  ;;  %v2284_v61 = vpop.eup %2283  ;;  %v1570_v53 = vpop.permute.xlu0 %1569  ;;  %v1532_v36 = vmul.f32 %v2282_v19, %v1524_v21 }
 0x954   : > { %v1596_v9 = vadd.f32 1.0, %v2284_v61 }
 0x955   : > { %v2286_v0 = vpop.eup %2285  ;;  %v1579_v1 = vadd.f32 %v1570_v53, %v1555_v28  ;;  %v1548_v2 = vpop.permute.xlu1 %1547 }
 0x956   : > { %v1610_v43 = vmul.f32 %v2286_v0, %v2280_v29  ;;  %v1556_v10 = vadd.f32 %v1548_v2, %v1532_v36  ;;  %v2288_v18 = vpop.eup %2287 }
 0x957   : > { %2289 = vtanh.f32 %v1579_v1  ;;  %1621 = vrot.lane.b32.xlu0 %v1579_v1, %s3238_s17 }
 0x958   : > { %2291 = vrcp.f32 %v1596_v9 }
 0x959   : > { %v1572_v13 = vpop.permute.xlu1 %1571 }
 0x95a   : > { %v1580_v15 = vadd.f32 %v1572_v13, %v1556_v10 }
 0x95c   : > { %2293 = vtanh.f32 %v1580_v15  ;;  %1623 = vrot.lane.b32.xlu1 %v1580_v15, %s3238_s17 }
 0x961   : > { %v2290_v23 = vpop.eup %2289 }
 0x962   : > { %v1611_v16 = vmul.f32 %v2290_v23, %v2288_v18  ;;  %v2292_v24 = vpop.eup %2291 }
 0x966   : > { %v2294_v25 = vpop.eup %2293 }
 0x967   : > { %v1612_v58 = vmul.f32 %v2294_v25, %v2292_v24 }
 0x9b7   : > { %v1618_v26 = vpop.permute.xlu0 %1617 }
 0x9b8   : > { %v1629_v4 = vsel %vm569_vm0, %v1609_v60, %v1618_v26 }
 0x9b9   : > { %1633 = vst.msk [vmem:[%s485_s27] sm:$0xff] %vm1121_vm2, %v1629_v4 }
 0x9bd   : > { %v1620_v30 = vpop.permute.xlu1 %1619 }
 0x9be   : > { %v1630_v57 = vsel %vm569_vm0, %v1610_v43, %v1620_v30 }
 0x9bf   : > { %1634 = vst.msk [vmem:[%s485_s27 + $0x8] sm:$0xff] %vm1121_vm2, %v1630_v57 }
 0x9c9   : > { %v1622_v59 = vpop.permute.xlu0 %1621 }
 0x9ca   : > { %v1631_v5 = vsel %vm569_vm0, %v1611_v16, %v1622_v59 }
 0x9cb   : > { %1635 = vst.msk [vmem:[%s485_s27 + $0x10] sm:$0xff] %vm1121_vm2, %v1631_v5 }
 0x9ce   : > { %v1624_v6 = vpop.permute.xlu1 %1623 }
 0x9cf   : > { %v1632_v22 = vsel %vm569_vm0, %v1612_v58, %v1624_v6 }
 0x9d0   : > { %1636 = vst.msk [vmem:[%s485_s27 + $0x18] sm:$0xff] %vm1121_vm2, %v1632_v22 }
 0x9d1   : > { %2308 = shalt.err (!%p2305_p3)
}
 0x9d2   : > { %s2309_s17 = scalar_lea.hbm %s3160_s19, 512  ;;  %s2313_s27 = scalar_lea.hbm %s3217_s12, 1024 }
 0x9d3   : > { %p2310_p4 = scmp.ne.s32.totalorder %s3160_s19, %s2309_s17  ;;  %p2314_p9 = scmp.lt.u32.totalorder %s3160_s19, %s3217_s12 }
 0x9d4   : > { %p2315_p10 = scmp.lt.u32.totalorder %s2313_s27, %s2309_s17  ;;  %p2317_p12 = scmp.lt.u32.totalorder %s2309_s17, %s3160_s19 }
 0x9d5   : > { %p2311_p7 = pnand %p2310_p4, %p2477_p5 }
 0x9d6   : > { %p2316_p11 = por %p2315_p10, %p2314_p9 }
 0x9d7   : > { %p2312_p8 = pneg %p2311_p7 }
 0x9d8   : > { %p2318_p13 = por %p2317_p12, %p2316_p11 }
 0x9da   : > { %p2319_p0 = pnand %p2318_p13, %p2312_p8 }
 0x9dc   : > { %2322 = shalt.err (!%p2319_p0)
}
 0x9dd   : > { %s2367_s14 = smov 128   ;;  %s2368_s22 = smov 8  }
 0x9de   : > { %2136 = dma.vmem_to_hbm [thread:$0]  (%p2477_p5), %s3155_s23, 512, %s3160_s19, %s3164_s21, %s2367_s14, %s2367_s14, %s2368_s22  }
 0x9df PF: > { %p2142_p1 = scmp.ge.s32.totalorder %s2357_s28, 2  ;;  %s1679_s24 = sand.u32 1, %s2345_s25  }
 0x9e0   : > { %s1680_s30 = scalar_lea.sflag [#allocation3], %s1679_s24 }
 0x9e1   : > { %p2139_p2 = pnand %p2142_p1, %p2481_p6 }
 0x9e3   : > { %2340 = dma.done.wait (!%p2139_p2), %s1680_s30, 512  }
 0x9e4   : > { %2342 = vsyncadd (!%p2139_p2), %s1680_s30, 4294966784  ;;  %s3240_s28 = sld [smem:[#allocation6_spill]]  ;;  %s3241_s17 = sld [smem:[#allocation5_spill]] }
 0x9e5   : > { %s3242_s27 = sld [smem:[#allocation7_spill]]  ;;  %s3243_s25 = smov %s2349_s26 }
 0x9ea   : > { %p24_p3 = scmp.ge.s32.totalorder %s3240_s28, 4   ;;  %s3244_s26 = smov %s3241_s17 }
 0x9ec   :  { %26 = sbr.rel (!%p24_p3) target bundleno = 5 (0x5), region = 124 }
 0x9f3   :  { %1693 = vsyncpa [#allocation3], 1 }
 0x9f4   :  { %1695 = vsyncpa [#allocation3 + $0x1], 1 }

</bundles_post_ra>
